<compile_context>
chip_gen: v7x
topology: tpu7x:2x2x1
jax: 0.10.0
libtpu: 0.0.40
codegen_flags: <defaults>
</compile_context>

<pallas_src>
import functools

import jax
import jax.numpy as jnp
import numpy as np
from jax import lax
from jax.experimental import pallas as pl
from jax.experimental.pallas import tpu as pltpu


def _vmem():
    return pl.BlockSpec(memory_space=pltpu.MemorySpace.VMEM)


def _sigmoid(x):
    return 1.0 / (1.0 + jnp.exp(-x))


# ----------------------------------------------------------------------------
# Kernel 1: fused char conv (all filter sizes) + max-pool over char positions.
# PyTorch Conv3d(1, nf, (1, f, char_dim)) on the char-embedding volume reduces to
# a width-f 1D conv over the char axis with char_dim input features + max-pool.
# ----------------------------------------------------------------------------
def char_conv_kernel(x_ref, *refs, filter_sizes):
    o_ref = refs[-1]
    wb = refs[:-1]                                   # (w0, b0, w1, b1, ...)
    x = x_ref[...].astype(jnp.float32)               # [TN, Lc, Cd]
    Lc = x.shape[1]
    outs = []
    for fi, f in enumerate(filter_sizes):
        w = wb[2 * fi][...]                          # [f*Cd, nf]
        b = wb[2 * fi + 1][...]                      # [1, nf]
        acc = None
        for p in range(Lc - f + 1):                  # static window loop
            # im2col window: lane-concat the f char rows -> contraction depth f*Cd
            win = jnp.concatenate([x[:, p + q, :] for q in range(f)], axis=-1)
            s = jnp.dot(win, w, preferred_element_type=jnp.float32)
            acc = s if acc is None else jnp.maximum(acc, s)
        outs.append(acc + b)                         # bias once, after the max
    # single (as-lane-dense-as-possible) store of all filters' outputs
    o_ref[...] = jnp.concatenate(outs, axis=-1).astype(o_ref.dtype)


def char_conv_pallas(char_emb, conv_ws, conv_bs, filter_sizes, char_dim):
    N, Lc, Cd = char_emb.shape
    # PyTorch Conv3d weight [nf, 1, 1, f, Cd] (squeezed to [nf, f, Cd]) -> [f*Cd, nf]
    w_flat = [w.reshape(w.shape[0], fs * char_dim).T
              for w, fs in zip(conv_ws, filter_sizes)]
    f_total = sum(int(w.shape[0]) for w in conv_ws)

    tile = N if N <= 512 else 512
    grid = (pl.cdiv(N, tile),)
    in_specs = [pl.BlockSpec((tile, Lc, Cd), lambda i: (i, 0, 0))]
    args = [char_emb]
    for w, b in zip(w_flat, conv_bs):
        in_specs.append(pl.BlockSpec(w.shape, lambda i: (0, 0)))
        in_specs.append(pl.BlockSpec(b.shape, lambda i: (0, 0)))
        args.extend([w, b])

    kernel = functools.partial(char_conv_kernel, filter_sizes=tuple(filter_sizes))
    return pl.pallas_call(
        kernel,
        out_shape=jax.ShapeDtypeStruct((N, f_total), jnp.float32),
        grid=grid,
        in_specs=in_specs,
        out_specs=pl.BlockSpec((tile, f_total), lambda i: (i, 0)),
        compiler_params=pltpu.CompilerParams(dimension_semantics=("parallel",)),
    )(*args)


# ----------------------------------------------------------------------------
# Kernel 2: tiled matmul + bias (optionally tanh on the input).  Used for the
# hoisted input-to-hidden GEMM of each BiLSTM layer and for the tanh+linear head.
# ----------------------------------------------------------------------------
def matmul_bias_kernel(x_ref, w_ref, b_ref, o_ref, *, tanh_input):
    x = x_ref[...]
    if tanh_input:
        x = jnp.tanh(x)
    y = jnp.dot(x, w_ref[...], preferred_element_type=jnp.float32) + b_ref[...]
    o_ref[...] = y.astype(o_ref.dtype)


def matmul_bias_pallas(x, w, b, *, tanh_input=False, tile_m=256):
    M, K = x.shape
    N = w.shape[1]
    tm = M if M <= tile_m else tile_m
    kernel = functools.partial(matmul_bias_kernel, tanh_input=tanh_input)
    return pl.pallas_call(
        kernel,
        out_shape=jax.ShapeDtypeStruct((M, N), jnp.float32),
        grid=(pl.cdiv(M, tm),),
        in_specs=[pl.BlockSpec((tm, K), lambda i: (i, 0)),
                  pl.BlockSpec((K, N), lambda i: (0, 0)),
                  pl.BlockSpec((1, N), lambda i: (0, 0))],
        out_specs=pl.BlockSpec((tm, N), lambda i: (i, 0)),
        compiler_params=pltpu.CompilerParams(dimension_semantics=("parallel",)),
    )(x, w, b)


# ----------------------------------------------------------------------------
# Kernel 3: BiLSTM recurrence only (input GEMM already hoisted).
# xw: [T, B, 8H] = x @ [Wih_f | Wih_b] + [b_f | b_b]  (time-major)
# fwd and bwd directions are interleaved in one fori_loop; output is a single
# lane-dense [T, B, 2H] tensor (fwd in 0:H, bwd in H:2H), PyTorch gate order i,f,g,o.
# ----------------------------------------------------------------------------
def bilstm_rec_kernel(xw_ref, whh_f_ref, whh_b_ref, o_ref, hf_scr, hb_scr, *, hidden):
    T, B, _ = xw_ref.shape
    H = hidden
    whh_f = whh_f_ref[...]
    whh_b = whh_b_ref[...]

    def cell(gates, c):
        i = _sigmoid(gates[:, 0:H])
        f = _sigmoid(gates[:, H:2 * H])
        g = jnp.tanh(gates[:, 2 * H:3 * H])
        o = _sigmoid(gates[:, 3 * H:4 * H])
        c_new = f * c + i * g
        return o * jnp.tanh(c_new), c_new

    def step(t, carry):
        h_f, c_f, h_b, c_b = carry
        tt = T - 1 - t
        xw_t = xw_ref[t]                       # [B, 8H]
        xw_tt = xw_ref[tt]                     # [B, 8H]
        g_f = xw_t[:, 0:4 * H] + jnp.dot(h_f, whh_f, preferred_element_type=jnp.float32)
        g_b = xw_tt[:, 4 * H:8 * H] + jnp.dot(h_b, whh_b, preferred_element_type=jnp.float32)
        h_f, c_f = cell(g_f, c_f)
        h_b, c_b = cell(g_b, c_b)
        hf_scr[t] = h_f
        hb_scr[tt] = h_b
        return (h_f, c_f, h_b, c_b)

    z = jnp.zeros((B, H), jnp.float32)
    lax.fori_loop(0, T, step, (z, z, z, z))

    # one dense store of the combined bidirectional output (no JAX-side concat)
    o_ref[...] = jnp.concatenate([hf_scr[...], hb_scr[...]], axis=-1).astype(o_ref.dtype)


def bilstm_layer(x_flat, layer_params, T, B, hidden):
    """x_flat: [T*B, I] time-major-flattened.  Returns [T*B, 2H]."""
    wih_f, whh_f, b_f, wih_b, whh_b, b_b = layer_params
    w_cat = jnp.concatenate([wih_f, wih_b], axis=1)      # [I, 8H]
    b_cat = jnp.concatenate([b_f, b_b], axis=1)          # [1, 8H]

    # hoisted input-to-hidden GEMM: one big MXU-friendly matmul (M = T*B, N = 8H)
    xw = matmul_bias_pallas(x_flat, w_cat, b_cat)        # [T*B, 8H]
    xw = xw.reshape(T, B, 8 * hidden)                    # free (contiguous) reshape

    kernel = functools.partial(bilstm_rec_kernel, hidden=hidden)
    h = pl.pallas_call(
        kernel,
        out_shape=jax.ShapeDtypeStruct((T, B, 2 * hidden), jnp.float32),
        in_specs=[_vmem()] * 3,
        out_specs=_vmem(),
        scratch_shapes=[pltpu.VMEM((T, B, hidden), jnp.float32),
                        pltpu.VMEM((T, B, hidden), jnp.float32)],
    )(xw, whh_f, whh_b)
    return h.reshape(T * B, 2 * hidden)                  # free reshape


# ----------------------------------------------------------------------------
# Full forward (glue + kernels).  All heavy tensors kept time-major / flattened.
# ----------------------------------------------------------------------------
def bilstm_cnn_forward(word_ids, char_ids, sentence_length, params, cfg):
    del sentence_length  # unused by this module's forward (no packing)
    B, T = word_ids.shape
    Lc = char_ids.shape[2]
    Cd = cfg["char_dim"]
    H = cfg["lstm_hiddens"]
    C = cfg["label_num"]

    # char path: embedding gather -> fused conv/maxpool kernel (time-major rows)
    char_tm = jnp.transpose(char_ids, (1, 0, 2)).reshape(T * B, Lc)
    char_emb = params["char_table"][char_tm]                           # [T*B, Lc, Cd]
    char_feat = char_conv_pallas(char_emb, params["conv_w"], params["conv_b"],
                                 cfg["conv_filter_sizes"], Cd)         # [T*B, sum(nf)]

    word_emb = params["word_table"][jnp.transpose(word_ids)]           # [T, B, D]
    x = jnp.concatenate([word_emb.reshape(T * B, -1), char_feat], axis=-1)
    # dropout_embed / dropout -> identity (eval)

    for layer_params in params["lstm"]:
        x = bilstm_layer(x, layer_params, T, B, H)                     # [T*B, 2H]
    # dropout -> identity (eval)

    logit = matmul_bias_pallas(x, params["lin_w"], params["lin_b"],
                               tanh_input=True)                        # [T*B, C]
    return jnp.transpose(logit.reshape(T, B, C), (1, 0, 2))            # [B, T, C]


# ----------------------------------------------------------------------------
# Pure-JAX reference (same math, no Pallas) for correctness check
# ----------------------------------------------------------------------------
def _lstm_dir_ref(x, wih, whh, b, H, reverse=False):
    B, T, _ = x.shape
    h = jnp.zeros((B, H), jnp.float32)
    c = jnp.zeros((B, H), jnp.float32)
    outs = [None] * T
    order = range(T - 1, -1, -1) if reverse else range(T)
    for t in order:
        gates = x[:, t, :] @ wih + h @ whh + b
        i = _sigmoid(gates[:, :H])
        f = _sigmoid(gates[:, H:2 * H])
        g = jnp.tanh(gates[:, 2 * H:3 * H])
        o = _sigmoid(gates[:, 3 * H:])
        c = f * c + i * g
        h = o * jnp.tanh(c)
        outs[t] = h
    return jnp.stack(outs, axis=1)


def bilstm_cnn_reference(word_ids, char_ids, params, cfg):
    B, T = word_ids.shape
    Lc = char_ids.shape[2]
    Cd = cfg["char_dim"]
    H = cfg["lstm_hiddens"]
    char_emb = params["char_table"][char_ids.reshape(-1)].reshape(B * T, Lc, Cd)
    conv_outs = []
    for f, w, b in zip(cfg["conv_filter_sizes"], params["conv_w"], params["conv_b"]):
        wins = []
        for p in range(Lc - f + 1):
            win = char_emb[:, p:p + f, :]
            wins.append(jnp.einsum("nfc,ofc->no", win, w) + b)
        conv_outs.append(jnp.max(jnp.stack(wins, 0), axis=0))
    char_conv = jnp.concatenate(conv_outs, axis=-1).reshape(B, T, -1)
    word_emb = params["word_table"][word_ids]
    h = jnp.concatenate([word_emb, char_conv], axis=-1)
    for (wih_f, whh_f, b_f, wih_b, whh_b, b_b) in params["lstm"]:
        out_f = _lstm_dir_ref(h, wih_f, whh_f, b_f, H, reverse=False)
        out_b = _lstm_dir_ref(h, wih_b, whh_b, b_b, H, reverse=True)
        h = jnp.concatenate([out_f, out_b], axis=-1)
    return jnp.tanh(h) @ params["lin_w"] + params["lin_b"]


# ----------------------------------------------------------------------------
# Deterministic parameter init (shapes from BiLSTM_CNN.__init__)
# ----------------------------------------------------------------------------
def init_params(key, cfg):
    V, D = cfg["embed_num"], cfg["embed_dim"]
    Vc, Cd = cfg["char_embed_num"], cfg["char_dim"]
    H, C = cfg["lstm_hiddens"], cfg["label_num"]
    ks = iter(jax.random.split(key, 64))

    def nrm(shape, scale):
        return (scale * jax.random.normal(next(ks), shape)).astype(jnp.float32)

    word_table = nrm((V, D), 0.1).at[cfg["paddingId"]].set(0.0)
    char_table = nrm((Vc, Cd), 0.1).at[cfg["char_paddingId"]].set(0.0)

    conv_w, conv_b = [], []
    for f, nf in zip(cfg["conv_filter_sizes"], cfg["conv_filter_nums"]):
        conv_w.append(nrm((nf, f, Cd), 0.2))   # Conv3d weight [nf,1,1,f,Cd] squeezed
        conv_b.append(nrm((1, nf), 0.1))

    lstm = []
    in_dim = D + sum(cfg["conv_filter_nums"])
    for _ in range(cfg["lstm_layers"]):
        layer = []
        for _dir in range(2):                  # forward, backward
            wih = nrm((in_dim, 4 * H), 0.1)    # transpose of PyTorch W_ih [4H, I]
            whh = nrm((H, 4 * H), 0.1)         # transpose of PyTorch W_hh [4H, H]
            bias = nrm((1, 4 * H), 0.1)        # b_ih + b_hh combined
            layer.extend([wih, whh, bias])
        lstm.append(tuple(layer))
        in_dim = 2 * H

    lin_w = nrm((2 * H, C), 0.1)
    lin_b = nrm((1, C), 0.1)
    return dict(word_table=word_table, char_table=char_table,
                conv_w=conv_w, conv_b=conv_b, lstm=lstm,
                lin_w=lin_w, lin_b=lin_b)


if __name__ == "__main__":
    cfg = dict(
        embed_num=50, embed_dim=16, label_num=5,
        paddingId=0, char_paddingId=0,
        char_embed_num=30, char_dim=8,
        conv_filter_sizes=[2, 3], conv_filter_nums=[8, 8],
        lstm_hiddens=32, lstm_layers=1,
        dropout_emb=0.0, dropout=0.0,
    )
    B, T, Lc = 2, 8, 8

    key = jax.random.PRNGKey(0)
    kp, kw, kc = jax.random.split(key, 3)
    params = init_params(kp, cfg)

    word = jax.random.randint(kw, (B, T), 0, cfg["embed_num"], dtype=jnp.int32)
    char = jax.random.randint(kc, (B, T, Lc), 0, cfg["char_embed_num"], dtype=jnp.int32)
    sentence_length = jnp.full((B,), T, dtype=jnp.int32)   # accepted but unused

    out = bilstm_cnn_forward(word, char, sentence_length, params, cfg)
    out = jax.block_until_ready(out)
    assert out.shape == (B, T, cfg["label_num"])

    ref = bilstm_cnn_reference(word, char, params, cfg)
    np.testing.assert_allclose(np.asarray(out), np.asarray(ref), rtol=2e-3, atol=2e-3)

    print("KERNEL_OK")
</pallas_src>

<mosaic_0001>
module attributes {stable_mosaic.version = 11 : i64} {
  func.func @char_conv_kernel(%arg0: i32, %arg1: memref<16x8x8xf32, #tpu.memory_space<vmem>>, %arg2: memref<16x8xf32, #tpu.memory_space<vmem>>, %arg3: memref<1x8xf32, #tpu.memory_space<vmem>>, %arg4: memref<24x8xf32, #tpu.memory_space<vmem>>, %arg5: memref<1x8xf32, #tpu.memory_space<vmem>>, %arg6: memref<16x16xf32, #tpu.memory_space<vmem>>) attributes {dimension_semantics = [#tpu.dimension_semantics<parallel>], iteration_bounds = array<i64: 1>, scalar_prefetch = 0 : i64, scratch_operands = 0 : i64, tpu.core_type = #tpu.core_type<tc>, window_params = [{transform_indices = @transform_0, window_bounds = array<i64: 16, 8, 8>}, {pipeline_mode = #tpu.pipeline_mode<synchronous>, transform_indices = @transform_1, window_bounds = array<i64: 16, 8>}, {pipeline_mode = #tpu.pipeline_mode<synchronous>, transform_indices = @transform_2, window_bounds = array<i64: 1, 8>}, {pipeline_mode = #tpu.pipeline_mode<synchronous>, transform_indices = @transform_3, window_bounds = array<i64: 24, 8>}, {pipeline_mode = #tpu.pipeline_mode<synchronous>, transform_indices = @transform_4, window_bounds = array<i64: 1, 8>}, {transform_indices = @transform_5, window_bounds = array<i64: 16, 16>}]} {
    %c0 = arith.constant 0 : index
    %c0_0 = arith.constant 0 : index
    %c0_1 = arith.constant 0 : index
    %0 = vector.load %arg1[%c0, %c0_0, %c0_1] : memref<16x8x8xf32, #tpu.memory_space<vmem>>, vector<16x8x8xf32>
    %c0_2 = arith.constant 0 : index
    %c0_3 = arith.constant 0 : index
    %1 = vector.load %arg2[%c0_2, %c0_3] : memref<16x8xf32, #tpu.memory_space<vmem>>, vector<16x8xf32>
    %c0_4 = arith.constant 0 : index
    %c0_5 = arith.constant 0 : index
    %2 = vector.load %arg3[%c0_4, %c0_5] : memref<1x8xf32, #tpu.memory_space<vmem>>, vector<1x8xf32>
    %3 = vector.extract_strided_slice %0 {offsets = [0, 0, 0], sizes = [16, 1, 8], strides = [1, 1, 1]} : vector<16x8x8xf32> to vector<16x1x8xf32>
    %4 = vector.shape_cast %3 : vector<16x1x8xf32> to vector<16x8xf32>
    %5 = vector.extract_strided_slice %0 {offsets = [0, 1, 0], sizes = [16, 1, 8], strides = [1, 1, 1]} : vector<16x8x8xf32> to vector<16x1x8xf32>
    %6 = vector.shape_cast %5 : vector<16x1x8xf32> to vector<16x8xf32>
    %7 = tpu.concatenate %4, %6 in 1 : vector<16x8xf32>, vector<16x8xf32> -> vector<16x16xf32>
    %cst = arith.constant dense<0.000000e+00> : vector<16x8xf32>
    %8 = tpu.matmul %7, %1, %cst {dimension_numbers = #tpu.dot_dimension_numbers<[1], [0], [0], [1], [0, 0, 1, 1], [], []>} : vector<16x16xf32>, vector<16x8xf32>, vector<16x8xf32> -> vector<16x8xf32>
    %9 = vector.extract_strided_slice %0 {offsets = [0, 1, 0], sizes = [16, 1, 8], strides = [1, 1, 1]} : vector<16x8x8xf32> to vector<16x1x8xf32>
    %10 = vector.shape_cast %9 : vector<16x1x8xf32> to vector<16x8xf32>
    %11 = vector.extract_strided_slice %0 {offsets = [0, 2, 0], sizes = [16, 1, 8], strides = [1, 1, 1]} : vector<16x8x8xf32> to vector<16x1x8xf32>
    %12 = vector.shape_cast %11 : vector<16x1x8xf32> to vector<16x8xf32>
    %13 = tpu.concatenate %10, %12 in 1 : vector<16x8xf32>, vector<16x8xf32> -> vector<16x16xf32>
    %cst_6 = arith.constant dense<0.000000e+00> : vector<16x8xf32>
    %14 = tpu.matmul %13, %1, %cst_6 {dimension_numbers = #tpu.dot_dimension_numbers<[1], [0], [0], [1], [0, 0, 1, 1], [], []>} : vector<16x16xf32>, vector<16x8xf32>, vector<16x8xf32> -> vector<16x8xf32>
    %15 = arith.maximumf %8, %14 : vector<16x8xf32>
    %16 = vector.extract_strided_slice %0 {offsets = [0, 2, 0], sizes = [16, 1, 8], strides = [1, 1, 1]} : vector<16x8x8xf32> to vector<16x1x8xf32>
    %17 = vector.shape_cast %16 : vector<16x1x8xf32> to vector<16x8xf32>
    %18 = vector.extract_strided_slice %0 {offsets = [0, 3, 0], sizes = [16, 1, 8], strides = [1, 1, 1]} : vector<16x8x8xf32> to vector<16x1x8xf32>
    %19 = vector.shape_cast %18 : vector<16x1x8xf32> to vector<16x8xf32>
    %20 = tpu.concatenate %17, %19 in 1 : vector<16x8xf32>, vector<16x8xf32> -> vector<16x16xf32>
    %cst_7 = arith.constant dense<0.000000e+00> : vector<16x8xf32>
    %21 = tpu.matmul %20, %1, %cst_7 {dimension_numbers = #tpu.dot_dimension_numbers<[1], [0], [0], [1], [0, 0, 1, 1], [], []>} : vector<16x16xf32>, vector<16x8xf32>, vector<16x8xf32> -> vector<16x8xf32>
    %22 = arith.maximumf %15, %21 : vector<16x8xf32>
    %23 = vector.extract_strided_slice %0 {offsets = [0, 3, 0], sizes = [16, 1, 8], strides = [1, 1, 1]} : vector<16x8x8xf32> to vector<16x1x8xf32>
    %24 = vector.shape_cast %23 : vector<16x1x8xf32> to vector<16x8xf32>
    %25 = vector.extract_strided_slice %0 {offsets = [0, 4, 0], sizes = [16, 1, 8], strides = [1, 1, 1]} : vector<16x8x8xf32> to vector<16x1x8xf32>
    %26 = vector.shape_cast %25 : vector<16x1x8xf32> to vector<16x8xf32>
    %27 = tpu.concatenate %24, %26 in 1 : vector<16x8xf32>, vector<16x8xf32> -> vector<16x16xf32>
    %cst_8 = arith.constant dense<0.000000e+00> : vector<16x8xf32>
    %28 = tpu.matmul %27, %1, %cst_8 {dimension_numbers = #tpu.dot_dimension_numbers<[1], [0], [0], [1], [0, 0, 1, 1], [], []>} : vector<16x16xf32>, vector<16x8xf32>, vector<16x8xf32> -> vector<16x8xf32>
    %29 = arith.maximumf %22, %28 : vector<16x8xf32>
    %30 = vector.extract_strided_slice %0 {offsets = [0, 4, 0], sizes = [16, 1, 8], strides = [1, 1, 1]} : vector<16x8x8xf32> to vector<16x1x8xf32>
    %31 = vector.shape_cast %30 : vector<16x1x8xf32> to vector<16x8xf32>
    %32 = vector.extract_strided_slice %0 {offsets = [0, 5, 0], sizes = [16, 1, 8], strides = [1, 1, 1]} : vector<16x8x8xf32> to vector<16x1x8xf32>
    %33 = vector.shape_cast %32 : vector<16x1x8xf32> to vector<16x8xf32>
    %34 = tpu.concatenate %31, %33 in 1 : vector<16x8xf32>, vector<16x8xf32> -> vector<16x16xf32>
    %cst_9 = arith.constant dense<0.000000e+00> : vector<16x8xf32>
    %35 = tpu.matmul %34, %1, %cst_9 {dimension_numbers = #tpu.dot_dimension_numbers<[1], [0], [0], [1], [0, 0, 1, 1], [], []>} : vector<16x16xf32>, vector<16x8xf32>, vector<16x8xf32> -> vector<16x8xf32>
    %36 = arith.maximumf %29, %35 : vector<16x8xf32>
    %37 = vector.extract_strided_slice %0 {offsets = [0, 5, 0], sizes = [16, 1, 8], strides = [1, 1, 1]} : vector<16x8x8xf32> to vector<16x1x8xf32>
    %38 = vector.shape_cast %37 : vector<16x1x8xf32> to vector<16x8xf32>
    %39 = vector.extract_strided_slice %0 {offsets = [0, 6, 0], sizes = [16, 1, 8], strides = [1, 1, 1]} : vector<16x8x8xf32> to vector<16x1x8xf32>
    %40 = vector.shape_cast %39 : vector<16x1x8xf32> to vector<16x8xf32>
    %41 = tpu.concatenate %38, %40 in 1 : vector<16x8xf32>, vector<16x8xf32> -> vector<16x16xf32>
    %cst_10 = arith.constant dense<0.000000e+00> : vector<16x8xf32>
    %42 = tpu.matmul %41, %1, %cst_10 {dimension_numbers = #tpu.dot_dimension_numbers<[1], [0], [0], [1], [0, 0, 1, 1], [], []>} : vector<16x16xf32>, vector<16x8xf32>, vector<16x8xf32> -> vector<16x8xf32>
    %43 = arith.maximumf %36, %42 : vector<16x8xf32>
    %44 = vector.extract_strided_slice %0 {offsets = [0, 6, 0], sizes = [16, 1, 8], strides = [1, 1, 1]} : vector<16x8x8xf32> to vector<16x1x8xf32>
    %45 = vector.shape_cast %44 : vector<16x1x8xf32> to vector<16x8xf32>
    %46 = vector.extract_strided_slice %0 {offsets = [0, 7, 0], sizes = [16, 1, 8], strides = [1, 1, 1]} : vector<16x8x8xf32> to vector<16x1x8xf32>
    %47 = vector.shape_cast %46 : vector<16x1x8xf32> to vector<16x8xf32>
    %48 = tpu.concatenate %45, %47 in 1 : vector<16x8xf32>, vector<16x8xf32> -> vector<16x16xf32>
    %cst_11 = arith.constant dense<0.000000e+00> : vector<16x8xf32>
    %49 = tpu.matmul %48, %1, %cst_11 {dimension_numbers = #tpu.dot_dimension_numbers<[1], [0], [0], [1], [0, 0, 1, 1], [], []>} : vector<16x16xf32>, vector<16x8xf32>, vector<16x8xf32> -> vector<16x8xf32>
    %50 = arith.maximumf %43, %49 : vector<16x8xf32>
    %51 = vector.broadcast %2 : vector<1x8xf32> to vector<16x8xf32>
    %52 = arith.addf %50, %51 : vector<16x8xf32>
    %c0_12 = arith.constant 0 : index
    %c0_13 = arith.constant 0 : index
    %53 = vector.load %arg4[%c0_12, %c0_13] : memref<24x8xf32, #tpu.memory_space<vmem>>, vector<24x8xf32>
    %c0_14 = arith.constant 0 : index
    %c0_15 = arith.constant 0 : index
    %54 = vector.load %arg5[%c0_14, %c0_15] : memref<1x8xf32, #tpu.memory_space<vmem>>, vector<1x8xf32>
    %55 = vector.extract_strided_slice %0 {offsets = [0, 0, 0], sizes = [16, 1, 8], strides = [1, 1, 1]} : vector<16x8x8xf32> to vector<16x1x8xf32>
    %56 = vector.shape_cast %55 : vector<16x1x8xf32> to vector<16x8xf32>
    %57 = vector.extract_strided_slice %0 {offsets = [0, 1, 0], sizes = [16, 1, 8], strides = [1, 1, 1]} : vector<16x8x8xf32> to vector<16x1x8xf32>
    %58 = vector.shape_cast %57 : vector<16x1x8xf32> to vector<16x8xf32>
    %59 = vector.extract_strided_slice %0 {offsets = [0, 2, 0], sizes = [16, 1, 8], strides = [1, 1, 1]} : vector<16x8x8xf32> to vector<16x1x8xf32>
    %60 = vector.shape_cast %59 : vector<16x1x8xf32> to vector<16x8xf32>
    %61 = tpu.concatenate %56, %58, %60 in 1 : vector<16x8xf32>, vector<16x8xf32>, vector<16x8xf32> -> vector<16x24xf32>
    %cst_16 = arith.constant dense<0.000000e+00> : vector<16x8xf32>
    %62 = tpu.matmul %61, %53, %cst_16 {dimension_numbers = #tpu.dot_dimension_numbers<[1], [0], [0], [1], [0, 0, 1, 1], [], []>} : vector<16x24xf32>, vector<24x8xf32>, vector<16x8xf32> -> vector<16x8xf32>
    %63 = vector.extract_strided_slice %0 {offsets = [0, 1, 0], sizes = [16, 1, 8], strides = [1, 1, 1]} : vector<16x8x8xf32> to vector<16x1x8xf32>
    %64 = vector.shape_cast %63 : vector<16x1x8xf32> to vector<16x8xf32>
    %65 = vector.extract_strided_slice %0 {offsets = [0, 2, 0], sizes = [16, 1, 8], strides = [1, 1, 1]} : vector<16x8x8xf32> to vector<16x1x8xf32>
    %66 = vector.shape_cast %65 : vector<16x1x8xf32> to vector<16x8xf32>
    %67 = vector.extract_strided_slice %0 {offsets = [0, 3, 0], sizes = [16, 1, 8], strides = [1, 1, 1]} : vector<16x8x8xf32> to vector<16x1x8xf32>
    %68 = vector.shape_cast %67 : vector<16x1x8xf32> to vector<16x8xf32>
    %69 = tpu.concatenate %64, %66, %68 in 1 : vector<16x8xf32>, vector<16x8xf32>, vector<16x8xf32> -> vector<16x24xf32>
    %cst_17 = arith.constant dense<0.000000e+00> : vector<16x8xf32>
    %70 = tpu.matmul %69, %53, %cst_17 {dimension_numbers = #tpu.dot_dimension_numbers<[1], [0], [0], [1], [0, 0, 1, 1], [], []>} : vector<16x24xf32>, vector<24x8xf32>, vector<16x8xf32> -> vector<16x8xf32>
    %71 = arith.maximumf %62, %70 : vector<16x8xf32>
    %72 = vector.extract_strided_slice %0 {offsets = [0, 2, 0], sizes = [16, 1, 8], strides = [1, 1, 1]} : vector<16x8x8xf32> to vector<16x1x8xf32>
    %73 = vector.shape_cast %72 : vector<16x1x8xf32> to vector<16x8xf32>
    %74 = vector.extract_strided_slice %0 {offsets = [0, 3, 0], sizes = [16, 1, 8], strides = [1, 1, 1]} : vector<16x8x8xf32> to vector<16x1x8xf32>
    %75 = vector.shape_cast %74 : vector<16x1x8xf32> to vector<16x8xf32>
    %76 = vector.extract_strided_slice %0 {offsets = [0, 4, 0], sizes = [16, 1, 8], strides = [1, 1, 1]} : vector<16x8x8xf32> to vector<16x1x8xf32>
    %77 = vector.shape_cast %76 : vector<16x1x8xf32> to vector<16x8xf32>
    %78 = tpu.concatenate %73, %75, %77 in 1 : vector<16x8xf32>, vector<16x8xf32>, vector<16x8xf32> -> vector<16x24xf32>
    %cst_18 = arith.constant dense<0.000000e+00> : vector<16x8xf32>
    %79 = tpu.matmul %78, %53, %cst_18 {dimension_numbers = #tpu.dot_dimension_numbers<[1], [0], [0], [1], [0, 0, 1, 1], [], []>} : vector<16x24xf32>, vector<24x8xf32>, vector<16x8xf32> -> vector<16x8xf32>
    %80 = arith.maximumf %71, %79 : vector<16x8xf32>
    %81 = vector.extract_strided_slice %0 {offsets = [0, 3, 0], sizes = [16, 1, 8], strides = [1, 1, 1]} : vector<16x8x8xf32> to vector<16x1x8xf32>
    %82 = vector.shape_cast %81 : vector<16x1x8xf32> to vector<16x8xf32>
    %83 = vector.extract_strided_slice %0 {offsets = [0, 4, 0], sizes = [16, 1, 8], strides = [1, 1, 1]} : vector<16x8x8xf32> to vector<16x1x8xf32>
    %84 = vector.shape_cast %83 : vector<16x1x8xf32> to vector<16x8xf32>
    %85 = vector.extract_strided_slice %0 {offsets = [0, 5, 0], sizes = [16, 1, 8], strides = [1, 1, 1]} : vector<16x8x8xf32> to vector<16x1x8xf32>
    %86 = vector.shape_cast %85 : vector<16x1x8xf32> to vector<16x8xf32>
    %87 = tpu.concatenate %82, %84, %86 in 1 : vector<16x8xf32>, vector<16x8xf32>, vector<16x8xf32> -> vector<16x24xf32>
    %cst_19 = arith.constant dense<0.000000e+00> : vector<16x8xf32>
    %88 = tpu.matmul %87, %53, %cst_19 {dimension_numbers = #tpu.dot_dimension_numbers<[1], [0], [0], [1], [0, 0, 1, 1], [], []>} : vector<16x24xf32>, vector<24x8xf32>, vector<16x8xf32> -> vector<16x8xf32>
    %89 = arith.maximumf %80, %88 : vector<16x8xf32>
    %90 = vector.extract_strided_slice %0 {offsets = [0, 4, 0], sizes = [16, 1, 8], strides = [1, 1, 1]} : vector<16x8x8xf32> to vector<16x1x8xf32>
    %91 = vector.shape_cast %90 : vector<16x1x8xf32> to vector<16x8xf32>
    %92 = vector.extract_strided_slice %0 {offsets = [0, 5, 0], sizes = [16, 1, 8], strides = [1, 1, 1]} : vector<16x8x8xf32> to vector<16x1x8xf32>
    %93 = vector.shape_cast %92 : vector<16x1x8xf32> to vector<16x8xf32>
    %94 = vector.extract_strided_slice %0 {offsets = [0, 6, 0], sizes = [16, 1, 8], strides = [1, 1, 1]} : vector<16x8x8xf32> to vector<16x1x8xf32>
    %95 = vector.shape_cast %94 : vector<16x1x8xf32> to vector<16x8xf32>
    %96 = tpu.concatenate %91, %93, %95 in 1 : vector<16x8xf32>, vector<16x8xf32>, vector<16x8xf32> -> vector<16x24xf32>
    %cst_20 = arith.constant dense<0.000000e+00> : vector<16x8xf32>
    %97 = tpu.matmul %96, %53, %cst_20 {dimension_numbers = #tpu.dot_dimension_numbers<[1], [0], [0], [1], [0, 0, 1, 1], [], []>} : vector<16x24xf32>, vector<24x8xf32>, vector<16x8xf32> -> vector<16x8xf32>
    %98 = arith.maximumf %89, %97 : vector<16x8xf32>
    %99 = vector.extract_strided_slice %0 {offsets = [0, 5, 0], sizes = [16, 1, 8], strides = [1, 1, 1]} : vector<16x8x8xf32> to vector<16x1x8xf32>
    %100 = vector.shape_cast %99 : vector<16x1x8xf32> to vector<16x8xf32>
    %101 = vector.extract_strided_slice %0 {offsets = [0, 6, 0], sizes = [16, 1, 8], strides = [1, 1, 1]} : vector<16x8x8xf32> to vector<16x1x8xf32>
    %102 = vector.shape_cast %101 : vector<16x1x8xf32> to vector<16x8xf32>
    %103 = vector.extract_strided_slice %0 {offsets = [0, 7, 0], sizes = [16, 1, 8], strides = [1, 1, 1]} : vector<16x8x8xf32> to vector<16x1x8xf32>
    %104 = vector.shape_cast %103 : vector<16x1x8xf32> to vector<16x8xf32>
    %105 = tpu.concatenate %100, %102, %104 in 1 : vector<16x8xf32>, vector<16x8xf32>, vector<16x8xf32> -> vector<16x24xf32>
    %cst_21 = arith.constant dense<0.000000e+00> : vector<16x8xf32>
    %106 = tpu.matmul %105, %53, %cst_21 {dimension_numbers = #tpu.dot_dimension_numbers<[1], [0], [0], [1], [0, 0, 1, 1], [], []>} : vector<16x24xf32>, vector<24x8xf32>, vector<16x8xf32> -> vector<16x8xf32>
    %107 = arith.maximumf %98, %106 : vector<16x8xf32>
    %108 = vector.broadcast %54 : vector<1x8xf32> to vector<16x8xf32>
    %109 = arith.addf %107, %108 : vector<16x8xf32>
    %110 = tpu.concatenate %52, %109 in 1 : vector<16x8xf32>, vector<16x8xf32> -> vector<16x16xf32>
    %c0_22 = arith.constant 0 : index
    %c0_23 = arith.constant 0 : index
    %111 = vector.load %arg6[%c0_22, %c0_23] : memref<16x16xf32, #tpu.memory_space<vmem>>, vector<16x16xf32>
    tpu.vector_store %arg6[%c0_22, %c0_23], %110 {strides = array<i32>} : memref<16x16xf32, #tpu.memory_space<vmem>>, vector<16x16xf32>,
    return
  }
  func.func @transform_0(%arg0: i32) -> (i32, i32, i32) {
    %c0_i32 = arith.constant 0 : i32
    %c0_i32_0 = arith.constant 0 : i32
    %c0_i32_1 = arith.constant 0 : i32
    return %arg0, %c0_i32, %c0_i32_0 : i32, i32, i32
  }
  func.func @transform_1(%arg0: i32) -> (i32, i32) {
    %c0_i32 = arith.constant 0 : i32
    %c0_i32_0 = arith.constant 0 : i32
    %c0_i32_1 = arith.constant 0 : i32
    return %c0_i32, %c0_i32_0 : i32, i32
  }
  func.func @transform_2(%arg0: i32) -> (i32, i32) {
    %c0_i32 = arith.constant 0 : i32
    %c0_i32_0 = arith.constant 0 : i32
    %c0_i32_1 = arith.constant 0 : i32
    return %c0_i32, %c0_i32_0 : i32, i32
  }
  func.func @transform_3(%arg0: i32) -> (i32, i32) {
    %c0_i32 = arith.constant 0 : i32
    %c0_i32_0 = arith.constant 0 : i32
    %c0_i32_1 = arith.constant 0 : i32
    return %c0_i32, %c0_i32_0 : i32, i32
  }
  func.func @transform_4(%arg0: i32) -> (i32, i32) {
    %c0_i32 = arith.constant 0 : i32
    %c0_i32_0 = arith.constant 0 : i32
    %c0_i32_1 = arith.constant 0 : i32
    return %c0_i32, %c0_i32_0 : i32, i32
  }
  func.func @transform_5(%arg0: i32) -> (i32, i32) {
    %c0_i32 = arith.constant 0 : i32
    %c0_i32_0 = arith.constant 0 : i32
    return %arg0, %c0_i32 : i32, i32
  }
}

</mosaic_0001>

<bundles_post_ra>
// kernel: tpu_custom_call.1
= control target key start
LH: loop header
LB: loop body
LE: loop exit
PB: predicated region body
PF: predicated region fallthrough
CT: control target
= control target key end

     0   :  { %vm63_vm0 = vcmask 1043459   ;;  %vm66_vm1 = vcmask 1044484   ;;  %vm69_vm2 = vcmask 1045509   ;;  %vm72_vm3 = vcmask 1046534   ;;  %s2003_s9 = smov 8   ;;  %s3200_s0 = inlined_call_operand.vmem [shape: f32[16,8,8], index: 0, kind: input, shape index: {}]   ;;  %s3201_s1 = inlined_call_operand.vmem [shape: f32[16,8], index: 1, kind: input, shape index: {}]   ;;  %s3202_s2 = inlined_call_operand.vmem [shape: f32[1,8], index: 2, kind: input, shape index: {}]   ;;  %s3203_s3 = inlined_call_operand.vmem [shape: f32[24,8], index: 3, kind: input, shape index: {}]   ;;  %s3204_s4 = inlined_call_operand.vmem [shape: f32[1,8], index: 4, kind: input, shape index: {}]   ;;  %s3205_s5 = inlined_call_operand.hbm [shape: f32[16,16], index: 5, kind: output, shape index: {}]  }
   0x1   :  { %v2040_v0 = vld [vmem:[%s3200_s0 + $0x78] sm:$0xff]  ;;  %v2045_v1 = vld [vmem:[%s3200_s0] sm:$0xff]  ;;  %v2050_v2 = vld [vmem:[%s3200_s0 + $0x8] sm:$0xff]  ;;  %vm75_vm4 = vcmask 1047559   ;;  %vm60_vm5 = vcmask 1042434   ;;  %vm57_vm6 = vcmask 1041409  }
   0x2   :  { %v2053_v3 = vrot.slane %v2040_v0, 2  ;;  %v2058_v4 = vld [vmem:[%s3200_s0 + $0x10] sm:$0xff]  ;;  %v2063_v5 = vld [vmem:[%s3200_s0 + $0x18] sm:$0xff]  ;;  %v2068_v6 = vld [vmem:[%s3200_s0 + $0x20] sm:$0xff]  ;;  %v2076_v8 = vrot.slane %v2045_v1, 1 }
   0x3   :  { %v2073_v7 = vld [vmem:[%s3200_s0 + $0x28] sm:$0xff]  ;;  %v2079_v9 = vrot.slane %v2058_v4, 7  ;;  %v2082_v10 = vrot.slane %v2063_v5, 6  ;;  %v2087_v11 = vld [vmem:[%s3200_s0 + $0x30] sm:$0xff]  ;;  %v2092_v12 = vrot.slane %v2068_v6, 5  ;;  %v2100_v14 = vld [vmem:[%s3200_s0 + $0x38] sm:$0xff] }
   0x4   :  { %245 = vrot.lane.b32.xlu1 %v2053_v3, %s2003_s9  ;;  %v2095_v13 = vrot.slane %v2073_v7, 4  ;;  %v2105_v15 = vld [vmem:[%s3200_s0 + $0x40] sm:$0xff]  ;;  %v359_v16 = vsel %vm63_vm0, %v2050_v2, %v2076_v8  ;;  %v2111_v17 = vrot.slane %v2087_v11, 3  ;;  %v228_v18 = vsel %vm60_vm5, %v2050_v2, %v2076_v8  ;;  %v2119_v19 = vld [vmem:[%s3200_s0 + $0x50] sm:$0xff]  ;;  %v2134_v24 = vld [vmem:[%s3200_s0 + $0x58] sm:$0xff] }
   0x5   :  { %v360_v20 = vsel %vm66_vm1, %v2079_v9, %v359_v16  ;;  %v229_v21 = vsel %vm63_vm0, %v2079_v9, %v228_v18  ;;  %v94_v22 = vsel %vm57_vm6, %v2050_v2, %v2076_v8  ;;  %v2129_v23 = vrot.slane %v2100_v14, 2  ;;  %v2145_v28 = vld [vmem:[%s3200_s0 + $0x60] sm:$0xff]  ;;  %v2150_v29 = vld [vmem:[%s3200_s0 + $0x68] sm:$0xff] }
   0x6   :  { %v361_v25 = vsel %vm69_vm2, %v2082_v10, %v360_v20  ;;  %v230_v26 = vsel %vm66_vm1, %v2082_v10, %v229_v21  ;;  %v96_v27 = vsel %vm60_vm5, %v2079_v9, %v94_v22  ;;  %v2153_v30 = vrot.slane %v2105_v15, 1 }
   0x7   :  { %10 = vsyncpa [#allocation3], 0  ;;  %v362_v31 = vsel %vm72_vm3, %v2092_v12, %v361_v25  ;;  %v231_v32 = vsel %vm69_vm2, %v2092_v12, %v230_v26  ;;  %v98_v33 = vsel %vm63_vm0, %v2082_v10, %v96_v27  ;;  %v2164_v34 = vld [vmem:[%s3200_s0 + $0x70] sm:$0xff]  ;;  %v2167_v35 = vrot.slane %v2119_v19, 7  ;;  %v2178_v39 = vld [vmem:[%s3200_s0 + $0x48] sm:$0xff]  ;;  %s2004_s0 = smov 16  }
   0x8   :  { %v363_v36 = vsel %vm75_vm4, %v2095_v13, %v362_v31  ;;  %v232_v37 = vsel %vm72_vm3, %v2095_v13, %v231_v32  ;;  %v100_v38 = vsel %vm66_vm1, %v2092_v12, %v98_v33  ;;  %v2181_v40 = vrot.slane %v2134_v24, 6  ;;  %s2005_s14 = smov [#allocation2]  }
   0x9   :  { %372 = vrot.lane.b32.xlu1 %v363_v36, %s2003_s9  ;;  %v233_v41 = vsel %vm75_vm4, %v2111_v17, %v232_v37  ;;  %v102_v42 = vsel %vm69_vm2, %v2095_v13, %v100_v38  ;;  %v2189_v43 = vrot.slane %v2145_v28, 5  ;;  %v2192_v44 = vrot.slane %v2150_v29, 4  ;;  %s1723_s15 = sshll.u32 %s2005_s14, 4  ;;  %s1724_s15 = int_to_ptr.vmem [resolvable:$true] %s1723_s15 }
   0xa   :  { %241 = vrot.lane.b32.xlu0 %v233_v41, %s2003_s9  ;;  %v104_v45 = vsel %vm72_vm3, %v2111_v17, %v102_v42  ;;  %v2198_v46 = vrot.slane %v2164_v34, 3  ;;  %v234_v47 = vsel %vm57_vm6, %v2153_v30, %v2129_v23  ;;  %v108_v48 = vsel %vm57_vm6, %v2178_v39, %v2153_v30  ;;  %p1984_p1 = scmp.lt.s32.totalorder %s1724_s15, %s1724_s15 }
   0xb   :  { %v106_v49 = vsel %vm75_vm4, %v2129_v23, %v104_v45  ;;  %v235_v50 = vsel %vm60_vm5, %v2178_v39, %v234_v47  ;;  %v110_v51 = vsel %vm60_vm5, %v2167_v35, %v108_v48  ;;  %v494_v52 = vsel %vm57_vm6, %v2111_v17, %v2095_v13 }
   0xc   :  { %v236_v53 = vsel %vm63_vm0, %v2167_v35, %v235_v50  ;;  %v371_v54 = vsel %vm57_vm6, %v2053_v3, %v2198_v46  ;;  %v112_v55 = vsel %vm63_vm0, %v2181_v40, %v110_v51  ;;  %v495_v56 = vsel %vm60_vm5, %v2129_v23, %v494_v52 }
   0xd   :  { %121 = vrot.lane.b32.xlu1 %v106_v49, %s2003_s9  ;;  %v237_v57 = vsel %vm66_vm1, %v2181_v40, %v236_v53  ;;  %v114_v58 = vsel %vm66_vm1, %v2189_v43, %v112_v55  ;;  %v496_v59 = vsel %vm63_vm0, %v2153_v30, %v495_v56  ;;  %v364_v60 = vsel %vm57_vm6, %v2129_v23, %v2111_v17 }
   0xe   :  { %v238_v61 = vsel %vm69_vm2, %v2189_v43, %v237_v57  ;;  %v116_v62 = vsel %vm69_vm2, %v2192_v44, %v114_v58  ;;  %v497_v63 = vsel %vm66_vm1, %v2178_v39, %v496_v59  ;;  %v365_v16 = vsel %vm60_vm5, %v2153_v30, %v364_v60 }
   0xf   :  { %v239_v18 = vsel %vm72_vm3, %v2192_v44, %v238_v61  ;;  %v118_v20 = vsel %vm72_vm3, %v2198_v46, %v116_v62  ;;  %v498_v21 = vsel %vm69_vm2, %v2167_v35, %v497_v63  ;;  %v366_v22 = vsel %vm63_vm0, %v2178_v39, %v365_v16 }
  0x10   :  { %v240_v25 = vsel %vm75_vm4, %v2198_v46, %v239_v18  ;;  %v120_v26 = vsel %vm75_vm4, %v2053_v3, %v118_v20  ;;  %v499_v27 = vsel %vm72_vm3, %v2181_v40, %v498_v21  ;;  %v367_v31 = vsel %vm66_vm1, %v2167_v35, %v366_v22 }
  0x11   :  { %243 = vrot.lane.b32.xlu0 %v240_v25, %s2003_s9  ;;  %376 = vrot.lane.b32.xlu1 %v371_v54, %s2003_s9  ;;  %v500_v32 = vsel %vm75_vm4, %v2189_v43, %v499_v27  ;;  %v368_v33 = vsel %vm69_vm2, %v2181_v40, %v367_v31  ;;  %v621_v36 = vsel %vm69_vm2, %v2050_v2, %v2076_v8  ;;  %v2278_v45 = vrot.slane %v2100_v14, 3 }
  0x12   :  { %v369_v37 = vsel %vm72_vm3, %v2189_v43, %v368_v33  ;;  %v622_v38 = vsel %vm72_vm3, %v2079_v9, %v621_v36  ;;  %v490_v41 = vsel %vm66_vm1, %v2050_v2, %v2076_v8  ;;  %v631_v42 = vsel %vm57_vm6, %v2192_v44, %v2189_v43 }
  0x13   :  { %v370_v47 = vsel %vm75_vm4, %v2192_v44, %v369_v37  ;;  %v491_v48 = vsel %vm69_vm2, %v2079_v9, %v490_v41  ;;  %v632_v49 = vsel %vm60_vm5, %v2198_v46, %v631_v42  ;;  %v623_v50 = vsel %vm75_vm4, %v2082_v10, %v622_v38 }
  0x14   :  { %v492_v51 = vsel %vm72_vm3, %v2082_v10, %v491_v48  ;;  %v501_v52 = vsel %vm57_vm6, %v2198_v46, %v2192_v44  ;;  %v754_v53 = vsel %vm57_vm6, %v2092_v12, %v2082_v10  ;;  %v633_v55 = vsel %vm63_vm0, %v2053_v3, %v632_v49 }
  0x15   :  { %123 = vrot.lane.b32.xlu0 %v120_v26, %s2003_s9  ;;  %505 = vrot.lane.b32.xlu1 %v500_v32, %s2003_s9  ;;  %v493_v54 = vsel %vm75_vm4, %v2092_v12, %v492_v51  ;;  %v755_v56 = vsel %vm60_vm5, %v2095_v13, %v754_v53  ;;  %v2305_v57 = vrot.slane %v2105_v15, 2  ;;  %v502_v58 = vsel %vm60_vm5, %v2053_v3, %v501_v52 }
  0x16   :  { %v756_v59 = vsel %vm63_vm0, %v2111_v17, %v755_v56  ;;  %v624_v60 = vsel %vm57_vm6, %v2095_v13, %v2092_v12  ;;  %v2317_v61 = vsel %vm75_vm4, %v2050_v2, %v2076_v8  ;;  %v752_v16 = vsel %vm72_vm3, %v2050_v2, %v2076_v8 }
  0x17   :  { %v757_v62 = vsel %vm66_vm1, %v2129_v23, %v756_v59  ;;  %v625_v63 = vsel %vm60_vm5, %v2111_v17, %v624_v60  ;;  %v891_v18 = vsel %vm57_vm6, %v2181_v40, %v2167_v35  ;;  %v761_v25 = vsel %vm57_vm6, %v2189_v43, %v2181_v40 }
  0x18   :  { %v758_v20 = vsel %vm69_vm2, %v2153_v30, %v757_v62  ;;  %v626_v21 = vsel %vm63_vm0, %v2129_v23, %v625_v63  ;;  %v892_v22 = vsel %vm60_vm5, %v2189_v43, %v891_v18  ;;  %v2347_v31 = vrot.slane %v2178_v39, 1 }
  0x19   :  { %374 = vrot.lane.b32.xlu0 %v370_v47, %s2003_s9  ;;  %634 = vrot.lane.b32.xlu1 %v623_v50, %s2003_s9  ;;  %v759_v8 = vsel %vm72_vm3, %v2178_v39, %v758_v20  ;;  %v627_v26 = vsel %vm66_vm1, %v2153_v30, %v626_v21  ;;  %v893_v27 = vsel %vm63_vm0, %v2192_v44, %v892_v22  ;;  %v2366_v42 = vrot.slane %v2134_v24, 7 }
  0x1a   :  { %v628_v32 = vsel %vm69_vm2, %v2178_v39, %v627_v26  ;;  %v2353_v43 = vsel %vm75_vm4, %v2079_v9, %v752_v16  ;;  %v894_v33 = vsel %vm66_vm1, %v2198_v46, %v893_v27  ;;  %v762_v36 = vsel %vm60_vm5, %v2192_v44, %v761_v25 }
  0x1b   :  { %v760_v37 = vsel %vm75_vm4, %v2167_v35, %v759_v8  ;;  %v629_v38 = vsel %vm72_vm3, %v2167_v35, %v628_v32  ;;  %v763_v41 = vsel %vm63_vm0, %v2198_v46, %v762_v36  ;;  %v895_v48 = vsel %vm69_vm2, %v2053_v3, %v894_v33 }
  0x1c   :  { %v630_v47 = vsel %vm75_vm4, %v2181_v40, %v629_v38  ;;  %v2374_v44 = vsel %vm66_vm1, %v2053_v3, %v763_v41  ;;  %v2377_v49 = vrot.slane %v2145_v28, 6  ;;  %v2382_v35 = vrot.slane %v2150_v29, 5 }
  0x1d   :  { %503 = vrot.lane.b32.xlu0 %v493_v54, %s2003_s9  ;;  %638 = vrot.lane.b32.xlu1 %v633_v55, %s2003_s9  ;;  %v1134_v40 = vsel %vm57_vm6, %v2305_v57, %v2278_v45  ;;  %v884_v46 = vsel %vm57_vm6, %v2082_v10, %v2079_v9  ;;  %v2391_v3 = vrot.slane %v2045_v1, 2  ;;  %v2398_v52 = vrot.slane %v2050_v2, 1 }
  0x1e   :  { %v1135_v50 = vsel %vm60_vm5, %v2347_v31, %v1134_v40  ;;  %v885_v51 = vsel %vm60_vm5, %v2092_v12, %v884_v46  ;;  %v2401_v53 = vrot.slane %v2063_v5, 7  ;;  %v2404_v54 = vrot.slane %v2164_v34, 4 }
  0x1f   :  { %v1136_v9 = vsel %vm63_vm0, %v2119_v19, %v1135_v50  ;;  %v886_v10 = vsel %vm63_vm0, %v2095_v13, %v885_v51  ;;  %v2411_v55 = vrot.slane %v2068_v6, 6  ;;  %v2418_v59 = vrot.slane %v2073_v7, 5 }
  0x20   :  { %v1137_v12 = vsel %vm66_vm1, %v2366_v42, %v1136_v9  ;;  %v887_v56 = vsel %vm66_vm1, %v2111_v17, %v886_v10  ;;  %v1128_v60 = vsel %vm60_vm5, %v2398_v52, %v2391_v3  ;;  %v2430_v63 = vrot.slane %v2087_v11, 4 }
  0x21   :  { %507 = vrot.lane.b32.xlu0 %v502_v58, %s2003_s9  ;;  %767 = vrot.lane.b32.xlu1 %v760_v37, %s2003_s9  ;;  %v1138_v13 = vsel %vm69_vm2, %v2377_v49, %v1137_v12  ;;  %v888_v62 = vsel %vm69_vm2, %v2129_v23, %v887_v56  ;;  %v1129_v17 = vsel %vm63_vm0, %v2058_v4, %v1128_v60  ;;  %v2446_v21 = vrot.slane %v2040_v0, 3 }
  0x22   :  { %v1139_v16 = vsel %vm72_vm3, %v2382_v35, %v1138_v13  ;;  %v889_v58 = vsel %vm72_vm3, %v2153_v30, %v888_v62  ;;  %v1130_v18 = vsel %vm66_vm1, %v2401_v53, %v1129_v17  ;;  %v1242_v20 = vsel %vm63_vm0, %v2398_v52, %v2391_v3 }
  0x23   :  { %v1140_v23 = vsel %vm75_vm4, %v2404_v54, %v1139_v16  ;;  %v1131_v22 = vsel %vm69_vm2, %v2411_v55, %v1130_v18  ;;  %v1243_v25 = vsel %vm66_vm1, %v2058_v4, %v1242_v20  ;;  %v890_v30 = vsel %vm75_vm4, %v2178_v39, %v889_v58 }
  0x24   :  { %v1132_v8 = vsel %vm72_vm3, %v2418_v59, %v1131_v22  ;;  %v1244_v26 = vsel %vm69_vm2, %v2401_v53, %v1243_v25  ;;  %v1012_v27 = vsel %vm57_vm6, %v2398_v52, %v2391_v3  ;;  %v2473_v36 = vsel %vm57_vm6, %v2446_v21, %v2404_v54 }
  0x25   :  { %636 = vrot.lane.b32.xlu0 %v630_v47, %s2003_s9  ;;  %896 = vrot.lane.b32.xlu1 %v2317_v61, %s2003_s9  ;;  %v2466_v32 = vsel %vm75_vm4, %v2430_v63, %v1132_v8  ;;  %v1013_v33 = vsel %vm60_vm5, %v2058_v4, %v1012_v27  ;;  %v1245_v37 = vsel %vm72_vm3, %v2411_v55, %v1244_v26  ;;  %vm130_vm7 = vcmask 130048  }
  0x26   :  { %v1015_v38 = vsel %vm63_vm0, %v2401_v53, %v1013_v33  ;;  %v1026_v61 = vsel %vm57_vm6, %v2347_v31, %v2305_v57  ;;  %v1360_v41 = vsel %vm57_vm6, %v2430_v63, %v2418_v59  ;;  %v1247_v50 = vsel %vm57_vm6, %v2278_v45, %v2430_v63 }
  0x27   :  { %v1017_v47 = vsel %vm66_vm1, %v2411_v55, %v1015_v38  ;;  %v1027_v40 = vsel %vm60_vm5, %v2119_v19, %v1026_v61  ;;  %v1361_v46 = vsel %vm60_vm5, %v2278_v45, %v1360_v41  ;;  %v1248_v12 = vsel %vm60_vm5, %v2305_v57, %v1247_v50 }
  0x28   :  { %v1019_v51 = vsel %vm69_vm2, %v2418_v59, %v1017_v47  ;;  %v1029_v9 = vsel %vm63_vm0, %v2366_v42, %v1027_v40  ;;  %v1362_v10 = vsel %vm63_vm0, %v2305_v57, %v1361_v46  ;;  %v1470_v20 = vsel %vm69_vm2, %v2398_v52, %v2391_v3 }
  0x29   :  { %765 = vrot.lane.b32.xlu0 %v2353_v43, %s2003_s9  ;;  %900 = vrot.lane.b32.xlu1 %v895_v48, %s2003_s9  ;;  %v1021_v56 = vsel %vm72_vm3, %v2430_v63, %v1019_v51  ;;  %v1031_v60 = vsel %vm66_vm1, %v2377_v49, %v1029_v9  ;;  %v1363_v13 = vsel %vm66_vm1, %v2347_v31, %v1362_v10  ;;  %v2518_v48 = vrot.slane %v2040_v0, 1 }
  0x2a   :  { %v1033_v62 = vsel %vm69_vm2, %v2382_v35, %v1031_v60  ;;  %v1364_v17 = vsel %vm69_vm2, %v2119_v19, %v1363_v13  ;;  %v1249_v43 = vsel %vm63_vm0, %v2347_v31, %v1248_v12  ;;  %v1246_v22 = vsel %vm75_vm4, %v2418_v59, %v1245_v37 }
  0x2b   :  { %v1035_v16 = vsel %vm72_vm3, %v2404_v54, %v1033_v62  ;;  %v1365_v58 = vsel %vm72_vm3, %v2366_v42, %v1364_v17  ;;  %v1250_v18 = vsel %vm66_vm1, %v2119_v19, %v1249_v43  ;;  %v1023_v0 = vsel %vm75_vm4, %v2278_v45, %v1021_v56 }
  0x2c   :  { %v1251_v25 = vsel %vm69_vm2, %v2366_v42, %v1250_v18  ;;  %v1471_v8 = vsel %vm72_vm3, %v2058_v4, %v1470_v20  ;;  %v2542_v26 = vsel %vm75_vm4, %v2446_v21, %v1035_v16  ;;  %v1356_v33 = vsel %vm66_vm1, %v2398_v52, %v2391_v3 }
  0x2d   :  { %769 = vrot.lane.b32.xlu0 %v2374_v44, %s2003_s9  ;;  %1143 = vrot.lane.b32.xlu1 %v1140_v23, %s2004_s0  ;;  %v1252_v27 = vsel %vm72_vm3, %v2377_v49, %v1251_v25  ;;  %v2550_v37 = vrot.slane %v2050_v2, 7  ;;  %v2554_v44 = vsel %vm75_vm4, %v2377_v49, %v1365_v58  ;;  %v1357_v23 = vsel %vm69_vm2, %v2058_v4, %v1356_v33 }
  0x2e   :  { %v1480_v38 = vsel %vm57_vm6, %v2382_v35, %v2377_v49  ;;  %v1367_v61 = vsel %vm57_vm6, %v2404_v54, %v2382_v35  ;;  %v2566_v41 = vsel %vm75_vm4, %v2382_v35, %v1252_v27  ;;  %v2570_v2 = vsel %vm75_vm4, %v2401_v53, %v1471_v8 }
  0x2f   :  { %v1358_v47 = vsel %vm72_vm3, %v2401_v53, %v1357_v23  ;;  %v1586_v40 = vsel %vm57_vm6, %v2411_v55, %v2401_v53  ;;  %v1481_v46 = vsel %vm60_vm5, %v2404_v54, %v1480_v38  ;;  %v2581_v50 = vsel %vm60_vm5, %v2446_v21, %v1367_v61 }
  0x30   :  { %v1587_v51 = vsel %vm60_vm5, %v2418_v59, %v1586_v40  ;;  %v1473_v9 = vsel %vm57_vm6, %v2418_v59, %v2411_v55  ;;  %v1584_v12 = vsel %vm72_vm3, %v2398_v52, %v2391_v3  ;;  %v2599_v56 = vrot.slane %v2058_v4, 6 }
  0x31   :  { %898 = vrot.lane.b32.xlu0 %v890_v30, %s2003_s9  ;;  %1145 = vrot.lane.b32.xlu1 %v2446_v21, %s2004_s0  ;;  %v1588_v53 = vsel %vm63_vm0, %v2430_v63, %v1587_v51  ;;  %v1474_v10 = vsel %vm60_vm5, %v2430_v63, %v1473_v9  ;;  %v2603_v59 = vsel %vm75_vm4, %v2411_v55, %v1358_v47  ;;  %v2621_v13 = vrot.slane %v2063_v5, 5 }
  0x32   :  { %v1589_v30 = vsel %vm66_vm1, %v2278_v45, %v1588_v53  ;;  %v1475_v60 = vsel %vm63_vm0, %v2278_v45, %v1474_v10  ;;  %v1593_v63 = vsel %vm57_vm6, %v2377_v49, %v2366_v42  ;;  %v2614_v3 = vsel %vm63_vm0, %v2446_v21, %v1481_v46 }
  0x33   :  { %v1590_v52 = vsel %vm69_vm2, %v2305_v57, %v1589_v30  ;;  %v1476_v55 = vsel %vm66_vm1, %v2305_v57, %v1475_v60  ;;  %v2629_v49 = vsel %vm75_vm4, %v2058_v4, %v1584_v12  ;;  %v2633_v17 = vsel %vm60_vm5, %v2382_v35, %v1593_v63 }
  0x34   :  { %v1591_v45 = vsel %vm72_vm3, %v2347_v31, %v1590_v52  ;;  %v1477_v62 = vsel %vm69_vm2, %v2347_v31, %v1476_v55  ;;  %v2647_v4 = vrot.slane %v2068_v6, 4  ;;  %v2650_v31 = vrot.slane %v2073_v7, 3 }
  0x35   :  { %1141 = vrot.lane.b32.xlu0 %v2466_v32, %s2004_s0  ;;  %1255 = vrot.lane.b32.xlu1 %v1246_v22, %s2004_s0  ;;  %v2640_v5 = vsel %vm75_vm4, %v2119_v19, %v1591_v45  ;;  %v2644_v57 = vsel %vm72_vm3, %v2119_v19, %v1477_v62  ;;  %v343_v35 = vsel %vm63_vm0, %v2550_v37, %v2045_v1  ;;  %v2656_v32 = vrot.slane %v2087_v11, 2  ;;  %v37_v11 = vld [vmem:[%s3201_s1] sm:$0xff] }
  0x36   :  { %v212_v43 = vsel %vm60_vm5, %v2550_v37, %v2045_v1  ;;  %v2662_v16 = vrot.slane %v2100_v14, 1  ;;  %v344_v6 = vsel %vm66_vm1, %v2599_v56, %v343_v35  ;;  %v2669_v58 = vrot.slane %v2178_v39, 7  ;;  %v38_v14 = vld [vmem:[%s3201_s1 + $0x8] sm:$0xff] }
  0x37   :  { %v213_v7 = vsel %vm63_vm0, %v2599_v56, %v212_v43  ;;  %v2672_v18 = vrot.slane %v2119_v19, 6  ;;  %v345_v20 = vsel %vm69_vm2, %v2621_v13, %v344_v6  ;;  %v2685_v39 = vrot.slane %v2134_v24, 5 }
  0x38   :  { %v214_v22 = vsel %vm66_vm1, %v2621_v13, %v213_v7  ;;  %v2688_v19 = vrot.slane %v2145_v28, 4  ;;  %v346_v25 = vsel %vm72_vm3, %v2647_v4, %v345_v20  ;;  %v2698_v27 = vrot.slane %v2150_v29, 3 }
  0x39   :  { %1038 = vrot.lane.b32.xlu0 %v1023_v0, %s2004_s0  ;;  %1259 = vrot.lane.b32.xlu1 %v2473_v36, %s2004_s0  ;;  %v215_v8 = vsel %vm69_vm2, %v2647_v4, %v214_v22  ;;  %v2701_v24 = vrot.slane %v2164_v34, 2  ;;  %v2705_v28 = vsel %vm75_vm4, %v2650_v31, %v346_v25  ;;  %v218_v36 = vsel %vm57_vm6, %v2105_v15, %v2662_v16 }
  0x3a   :  { %v216_v0 = vsel %vm72_vm3, %v2650_v31, %v215_v8  ;;  %v2712_v33 = vpack.c.bf16 %v38_v14, %v37_v11  ;;  %v219_v34 = vsel %vm60_vm5, %v2669_v58, %v218_v36  ;;  %v78_v38 = vsel %vm57_vm6, %v2669_v58, %v2105_v15 }
  0x3b   :  { %v2716_v29 = vsel %vm75_vm4, %v2656_v32, %v216_v0  ;;  %v2723_v23 = vsel %vm57_vm6, %v2518_v48, %v2701_v24  ;;  %v220_v61 = vsel %vm63_vm0, %v2672_v18, %v219_v34  ;;  %v80_v47 = vsel %vm60_vm5, %v2672_v18, %v78_v38 }
  0x3c   :  { %1924 = vmatprep.subr.bf16.mxu0 %v2712_v33  ;;  %1928 = vmatprep.subr.bf16.mxu1 %v2712_v33  ;;  %v58_v40 = vsel %vm57_vm6, %v2550_v37, %v2045_v1  ;;  %v221_v46 = vsel %vm66_vm1, %v2685_v39, %v220_v61  ;;  %v82_v51 = vsel %vm63_vm0, %v2685_v39, %v80_v47  ;;  %vm127_vm8 = vcmask 64512  }
  0x3d   :  { %1040 = vrot.lane.b32.xlu0 %v2542_v26, %s2004_s0  ;;  %1371 = vrot.lane.b32.xlu1 %v2554_v44, %s2004_s0  ;;  %v61_v9 = vsel %vm60_vm5, %v2599_v56, %v58_v40  ;;  %v222_v53 = vsel %vm69_vm2, %v2688_v19, %v221_v46  ;;  %v84_v26 = vsel %vm66_vm1, %v2688_v19, %v82_v51  ;;  %vm256_vm9 = vcmask 1046528  }
  0x3e   :  { %1926 = vmatpush3.bf16.msra.mxu0 %v2712_v33  ;;  %1930 = vmatpush3.bf16.msra.mxu1 %v2712_v33  ;;  %v64_v44 = vsel %vm63_vm0, %v2621_v13, %v61_v9  ;;  %v223_v10 = vsel %vm72_vm3, %v2698_v27, %v222_v53  ;;  %v86_v12 = vsel %vm69_vm2, %v2698_v27, %v84_v26  ;;  %vm387_vm10 = vcmask 1045504  }
  0x3f   :  { %v67_v30 = vsel %vm66_vm1, %v2647_v4, %v64_v44  ;;  %v478_v60 = vsel %vm57_vm6, %v2656_v32, %v2650_v31  ;;  %1932 = vmatprep.subr.bf16.mxu0 %v2712_v33  ;;  %v2767_v63 = vsel %vm75_vm4, %v2701_v24, %v223_v10  ;;  %v88_v52 = vsel %vm72_vm3, %v2701_v24, %v86_v12 }
  0x40   :  { %v70_v55 = vsel %vm69_vm2, %v2650_v31, %v67_v30  ;;  %v479_v45 = vsel %vm60_vm5, %v2662_v16, %v478_v60  ;;  %1936 = vmatprep.subr.bf16.mxu1 %v2712_v33  ;;  %v2782_v62 = vsel %vm75_vm4, %v2518_v48, %v88_v52  ;;  %v605_v7 = vsel %vm69_vm2, %v2550_v37, %v2045_v1 }
  0x41   :  { %1257 = vrot.lane.b32.xlu0 %v2566_v41, %s2004_s0  ;;  %1483 = vrot.lane.b32.xlu1 %v2570_v2, %s2004_s0  ;;  %v73_v35 = vsel %vm72_vm3, %v2656_v32, %v70_v55  ;;  %v480_v43 = vsel %vm63_vm0, %v2105_v15, %v479_v45  ;;  %v348_v2 = vsel %vm57_vm6, %v2662_v16, %v2656_v32  ;;  %vm518_vm11 = vcmask 1044480  }
  0x42   :  { %v2790_v6 = vsel %vm75_vm4, %v2662_v16, %v73_v35  ;;  %v481_v41 = vsel %vm66_vm1, %v2669_v58, %v480_v43  ;;  %v349_v14 = vsel %vm60_vm5, %v2105_v15, %v348_v2  ;;  %v606_v20 = vsel %vm72_vm3, %v2599_v56, %v605_v7 }
  0x43   :  { %v482_v11 = vsel %vm69_vm2, %v2672_v18, %v481_v41  ;;  %v474_v22 = vsel %vm66_vm1, %v2550_v37, %v2045_v1  ;;  %v350_v8 = vsel %vm63_vm0, %v2669_v58, %v349_v14  ;;  %v2815_v0 = vsel %vm75_vm4, %v2621_v13, %v606_v20 }
  0x44   :  { %v483_v25 = vsel %vm72_vm3, %v2685_v39, %v482_v11  ;;  %v475_v36 = vsel %vm69_vm2, %v2599_v56, %v474_v22  ;;  %v351_v38 = vsel %vm66_vm1, %v2672_v18, %v350_v8  ;;  %v738_v53 = vsel %vm57_vm6, %v2647_v4, %v2621_v13 }
  0x45   :  { %1369 = vrot.lane.b32.xlu0 %v2603_v59, %s2004_s0  ;;  %1487 = vrot.lane.b32.xlu1 %v2614_v3, %s2004_s0  ;;  %v2825_v34 = vsel %vm75_vm4, %v2688_v19, %v483_v25  ;;  %v476_v61 = vsel %vm72_vm3, %v2621_v13, %v475_v36  ;;  %v352_v47 = vsel %vm69_vm2, %v2685_v39, %v351_v38  ;;  %vm649_vm12 = vcmask 1043456  }
  0x46   :  { %v2835_v40 = vsel %vm75_vm4, %v2647_v4, %v476_v61  ;;  %v615_v59 = vsel %vm57_vm6, %v2698_v27, %v2688_v19  ;;  %v485_v3 = vsel %vm57_vm6, %v2701_v24, %v2698_v27  ;;  %v353_v46 = vsel %vm72_vm3, %v2688_v19, %v352_v47 }
  0x47   :  { %v616_v51 = vsel %vm60_vm5, %v2701_v24, %v615_v59  ;;  %v2849_v9 = vsel %vm60_vm5, %v2518_v48, %v485_v3  ;;  %v2856_v26 = vsel %vm75_vm4, %v2698_v27, %v353_v46  ;;  %v739_v10 = vsel %vm60_vm5, %v2650_v31, %v738_v53 }
  0x48   :  { %v2860_v44 = vsel %vm63_vm0, %v2518_v48, %v616_v51  ;;  %v608_v12 = vsel %vm57_vm6, %v2650_v31, %v2647_v4  ;;  %v1479_v30 = vsel %vm75_vm4, %v2366_v42, %v2644_v57  ;;  %v740_v60 = vsel %vm63_vm0, %v2656_v32, %v739_v10 }
  0x49   :  { %1373 = vrot.lane.b32.xlu0 %v2581_v50, %s2004_s0  ;;  %1599 = vrot.lane.b32.xlu1 %v2640_v5, %s2004_s0  ;;  %v609_v52 = vsel %vm60_vm5, %v2656_v32, %v608_v12  ;;  %v741_v55 = vsel %vm66_vm1, %v2662_v16, %v740_v60  ;;  %v736_v50 = vsel %vm72_vm3, %v2550_v37, %v2045_v1  ;;  %vm780_vm13 = vcmask 1042432  }
  0x4a   :  { %v610_v45 = vsel %vm63_vm0, %v2662_v16, %v609_v52  ;;  %v875_v42 = vsel %vm57_vm6, %v2685_v39, %v2672_v18  ;;  %v742_v5 = vsel %vm69_vm2, %v2105_v15, %v741_v55  ;;  %v2894_v35 = vsel %vm75_vm4, %v2599_v56, %v736_v50 }
  0x4b   :  { %v611_v57 = vsel %vm66_vm1, %v2105_v15, %v610_v45  ;;  %v876_v43 = vsel %vm60_vm5, %v2688_v19, %v875_v42  ;;  %v743_v41 = vsel %vm72_vm3, %v2669_v58, %v742_v5  ;;  %v745_v11 = vsel %vm57_vm6, %v2688_v19, %v2685_v39 }
  0x4c   :  { %v612_v2 = vsel %vm69_vm2, %v2669_v58, %v611_v57  ;;  %v877_v7 = vsel %vm63_vm0, %v2698_v27, %v876_v43  ;;  %v2910_v14 = vsel %vm75_vm4, %v2672_v18, %v743_v41  ;;  %v746_v25 = vsel %vm60_vm5, %v2698_v27, %v745_v11 }
  0x4d   :  { %1485 = vrot.lane.b32.xlu0 %v1479_v30, %s2004_s0  ;;  %v613_v20 = vsel %vm72_vm3, %v2672_v18, %v612_v2  ;;  %v878_v22 = vsel %vm66_vm1, %v2701_v24, %v877_v7  ;;  %v747_v36 = vsel %vm63_vm0, %v2701_v24, %v746_v25  ;;  %v868_v18 = vsel %vm57_vm6, %v2621_v13, %v2599_v56 }
  0x4e   :  { %v2920_v8 = vsel %vm75_vm4, %v2685_v39, %v613_v20  ;;  %v2924_v19 = vsel %vm69_vm2, %v2518_v48, %v878_v22  ;;  %v1595_v38 = vsel %vm63_vm0, %v2404_v54, %v2633_v17  ;;  %v2936_v27 = vsel %vm66_vm1, %v2518_v48, %v747_v36  ;;  %v1006_v22 = vld [vmem:[%s3203_s3] sm:$0xff] }
  0x4f   :  { %v869_v39 = vsel %vm60_vm5, %v2647_v4, %v868_v18  ;;  %v1596_v13 = vsel %vm66_vm1, %v2446_v21, %v1595_v38  ;;  %vm911_vm14 = vcmask 1041408   ;;  %vm1046_vm15 = vcmask 195584  }
  0x50   :  { %v870_v61 = vsel %vm63_vm0, %v2650_v31, %v869_v39 }
  0x51   :  { %1597 = vrot.lane.b32.xlu0 %v2629_v49, %s2004_s0  ;;  %v871_v56 = vsel %vm66_vm1, %v2656_v32, %v870_v61 }
  0x52   :  { %v872_v54 = vsel %vm69_vm2, %v2662_v16, %v871_v56 }
  0x53   :  { %v873_v17 = vsel %vm72_vm3, %v2105_v15, %v872_v54 }
  0x54   :  { %v2954_v4 = vsel %vm75_vm4, %v2669_v58, %v873_v17 }
  0x55   :  { %1601 = vrot.lane.b32.xlu0 %v1596_v13, %s2004_s0 }
  0x76   :  { %v246_v31 = vpop.permute.xlu1 %245 }
  0x77   :  { %v2959_v21 = vsel %vm127_vm8, %v2518_v48, %v246_v31 }
  0x78   :  { %v260_v58 = vrot.slane %v2959_v21, 1 }
  0x7b   :  { %v373_v49 = vpop.permute.xlu1 %372 }
  0x7c   :  { %v242_v24 = vpop.permute.xlu0 %241 }
  0x7d   :  { %v2969_v15 = vsel %vm127_vm8, %v2716_v29, %v242_v24 }
  0x7e   :  { %v257_v48 = vrot.slane %v2969_v15, 1 }
  0x7f   :  { %v122_v32 = vpop.permute.xlu1 %121 }
  0x80   :  { %v2963_v16 = vsel %vm127_vm8, %v2790_v6, %v122_v32 }
  0x81   :  { %1824 = vmatprep.mubr.msk.f32.mxu0 %vm130_vm7, %v2963_v16 }
  0x83   :  { %v244_v47 = vpop.permute.xlu0 %243  ;;  %v377_v59 = vpop.permute.xlu1 %376 }
  0x84   :  { %v2974_v3 = vsel %vm127_vm8, %v2767_v63, %v244_v47  ;;  %v2982_v10 = vsel %vm127_vm8, %v2723_v23, %v377_v59  ;;  %v2994_v63 = vsel %vm127_vm8, %v2705_v28, %v373_v49  ;;  %v867_v49 = vsel %vm75_vm4, %v2550_v37, %v2045_v1 }
  0x85   :  { %v258_v6 = vrot.slane %v2974_v3, 1  ;;  %v391_v23 = vrot.slane %v2982_v10, 2  ;;  %v388_v52 = vrot.slane %v2994_v63, 2 }
  0x87   :  { %v124_v46 = vpop.permute.xlu0 %123  ;;  %v259_v51 = vsel %vm256_vm9, %v257_v48, %v258_v6  ;;  %v261_v53 = vsel %vm256_vm9, %v258_v6, %v260_v58  ;;  %v506_v29 = vpop.permute.xlu1 %505 }
  0x88   :  { %v2986_v12 = vsel %vm127_vm8, %v2782_v62, %v124_v46  ;;  %1831 = vmatprep.mubr.msk.f32.mxu1 %vm130_vm7, %v259_v51  ;;  %v3003_v60 = vsel %vm127_vm8, %v2825_v34, %v506_v29 }
  0x89   :  { %1825 = vmatmul.mubr.msk.f32.vlgmr.msra.gmra.mrb[0].mxu0 %vm130_vm7, %v2986_v12  ;;  %1832 = vmatmul.mubr.msk.f32.vlgmr.msra.gmra.mrb[0].mxu1 %vm130_vm7, %v261_v53  ;;  %v520_v45 = vrot.slane %v3003_v60, 3 }
  0x8a   :  { %1934 = vmatpush3.bf16.msra.mxu0 %v2712_v33  ;;  %1938 = vmatpush3.bf16.msra.mxu1 %v2712_v33 }
  0x8b   :  { %v375_v30 = vpop.permute.xlu0 %374  ;;  %v635_v62 = vpop.permute.xlu1 %634  ;;  %1940 = vmatprep.subr.bf16.mxu0 %v2712_v33  ;;  %1944 = vmatprep.subr.bf16.mxu1 %v2712_v33 }
  0x8c   :  { %v3007_v28 = vsel %vm127_vm8, %v2856_v26, %v375_v30  ;;  %v3026_v7 = vsel %vm127_vm8, %v2815_v0, %v635_v62  ;;  %v1007_v0 = vld [vmem:[%s3203_s3 + $0x8] sm:$0xff] }
  0x8d   :  { %v389_v55 = vrot.slane %v3007_v28, 2  ;;  %v650_v25 = vrot.slane %v3026_v7, 4  ;;  %v3056_v61 = vpack.c.bf16 %v1007_v0, %v1006_v22 }
  0x8f   :  { %v504_v50 = vpop.permute.xlu0 %503  ;;  %v390_v42 = vsel %vm387_vm10, %v388_v52, %v389_v55  ;;  %v392_v5 = vsel %vm387_vm10, %v389_v55, %v391_v23  ;;  %v639_v57 = vpop.permute.xlu1 %638 }
  0x90   :  { %v3016_v34 = vsel %vm127_vm8, %v2835_v40, %v504_v50  ;;  %1838 = vmatprep.mubr.msk.f32.mxu0 %vm130_vm7, %v390_v42  ;;  %v3030_v40 = vsel %vm127_vm8, %v2860_v44, %v639_v57 }
  0x91   :  { %v519_v26 = vrot.slane %v3016_v34, 3  ;;  %1839 = vmatmul.mubr.msk.f32.vlgmr.msra.gmra.mrb[2].mxu0 %vm130_vm7, %v392_v5  ;;  %v653_v44 = vrot.slane %v3030_v40, 4 }
  0x92   :  { %1942 = vmatpush3.bf16.msra.mxu0 %v2712_v33 }
  0x93   :  { %v508_v43 = vpop.permute.xlu0 %507  ;;  %v521_v41 = vsel %vm518_vm11, %v519_v26, %v520_v45  ;;  %v768_v2 = vpop.permute.xlu1 %767  ;;  %1948 = vmatprep.subr.bf16.mxu0 %v2712_v33 }
  0x94   :  { %v3034_v11 = vsel %vm127_vm8, %v2849_v9, %v508_v43  ;;  %1845 = vmatprep.mubr.msk.f32.mxu1 %vm130_vm7, %v521_v41  ;;  %v3049_v38 = vsel %vm127_vm8, %v2910_v14, %v768_v2 }
  0x95   :  { %v522_v20 = vrot.slane %v3034_v11, 3  ;;  %v782_v13 = vrot.slane %v3049_v38, 5 }
  0x97   :  { %v637_v36 = vpop.permute.xlu0 %636  ;;  %v523_v9 = vsel %vm518_vm11, %v520_v45, %v522_v20  ;;  %v897_v18 = vpop.permute.xlu1 %896 }
  0x98   :  { %v3053_v39 = vsel %vm127_vm8, %v2920_v8, %v637_v36  ;;  %1846 = vmatmul.mubr.msk.f32.vlgmr.msra.gmra.mrb[2].mxu1 %vm130_vm7, %v523_v9 }
  0x99   :  { %v651_v56 = vrot.slane %v3053_v39, 4  ;;  %1946 = vmatpush3.bf16.msra.mxu1 %v2712_v33 }
  0x9a   :  { %1952 = vmatprep.subr.bf16.mxu1 %v3056_v61 }
  0x9b   :  { %v766_v54 = vpop.permute.xlu0 %765  ;;  %v652_v14 = vsel %vm649_vm12, %v650_v25, %v651_v56  ;;  %v654_v17 = vsel %vm649_vm12, %v651_v56, %v653_v44  ;;  %v901_v8 = vpop.permute.xlu1 %900 }
  0x9c   :  { %v3066_v31 = vsel %vm127_vm8, %v2894_v35, %v766_v54  ;;  %1852 = vmatprep.mubr.msk.f32.mxu0 %vm130_vm7, %v652_v14  ;;  %v905_v35 = vsel %vm127_vm8, %v867_v49, %v897_v18  ;;  %v907_v59 = vsel %vm127_vm8, %v2924_v19, %v901_v8 }
  0x9d   :  { %v781_v24 = vrot.slane %v3066_v31, 5  ;;  %1853 = vmatmul.mubr.msk.f32.vlgmr.msra.gmra.mrb[4].mxu0 %vm130_vm7, %v654_v17  ;;  %v912_v48 = vrot.slane %v905_v35, 6  ;;  %v915_v6 = vrot.slane %v907_v59, 6 }
  0x9e   :  { %1950 = vmatpush3.bf16.msra.mxu0 %v2712_v33 }
  0x9f   :  { %v770_v32 = vpop.permute.xlu0 %769  ;;  %v783_v58 = vsel %vm780_vm13, %v781_v24, %v782_v13  ;;  %v1144_v47 = vpop.permute.xlu1 %1143  ;;  %1956 = vmatprep.subr.bf16.mxu0 %v3056_v61 }
  0xa0   :  { %v3082_v1 = vsel %vm127_vm8, %v2936_v27, %v770_v32  ;;  %1859 = vmatprep.mubr.msk.f32.mxu1 %vm130_vm7, %v783_v58  ;;  %v1151_v33 = vsel %vm130_vm7, %v2974_v3, %v1144_v47  ;;  %v3098_v3 = vld [vmem:[%s3203_s3 + $0x10] sm:$0xff] }
  0xa1   :  { %v784_v37 = vrot.slane %v3082_v1, 5  ;;  %v1157_v29 = vrot.slane %v1151_v33, 1 }
  0xa3   :  { %v899_v46 = vpop.permute.xlu0 %898  ;;  %v785_v51 = vsel %vm780_vm13, %v782_v13, %v784_v37  ;;  %v1146_v53 = vpop.permute.xlu1 %1145 }
  0xa4   :  { %v906_v19 = vsel %vm127_vm8, %v2954_v4, %v899_v46  ;;  %1860 = vmatmul.mubr.msk.f32.vlgmr.msra.gmra.mrb[4].mxu1 %vm130_vm7, %v785_v51  ;;  %v1152_v27 = vsel %vm130_vm7, %v2959_v21, %v1146_v53 }
  0xa5   :  { %v913_v23 = vrot.slane %v906_v19, 6  ;;  %v1159_v30 = vrot.slane %v1152_v27, 1  ;;  %1954 = vmatpush3.bf16.msra.mxu1 %v3056_v61 }
  0xa6   :  { %1873 = vmatprep.subr.mxu1 %v3098_v3 }
  0xa7   :  { %v1142_v62 = vpop.permute.xlu0 %1141  ;;  %v914_v4 = vsel %vm911_vm14, %v912_v48, %v913_v23  ;;  %v916_v52 = vsel %vm911_vm14, %v913_v23, %v915_v6  ;;  %v1256_v55 = vpop.permute.xlu1 %1255  ;;  %v1160_v45 = vsel %vm256_vm9, %v1157_v29, %v1159_v30 }
  0xa8   :  { %v1150_v21 = vsel %vm130_vm7, %v2969_v15, %v1142_v62  ;;  %1866 = vmatprep.mubr.msk.f32.mxu0 %vm130_vm7, %v914_v4 }
  0xa9   :  { %v1156_v50 = vrot.slane %v1150_v21, 1  ;;  %1867 = vmatmul.mubr.msk.f32.vlgmr.msra.gmra.mrb[6].mxu0 %vm130_vm7, %v916_v52  ;;  %1874 = vmatpush3.msra.mxu1 %v3098_v3 }
  0xaa   :  { %1958 = vmatpush3.bf16.msra.mxu0 %v3056_v61  ;;  %1960 = vmatprep.subr.bf16.mxu1 %v3056_v61 }
  0xab   :  { %v1039_v42 = vpop.permute.xlu0 %1038  ;;  %1882 = vmatprep.subr.mxu0 %v3098_v3  ;;  %v1158_v5 = vsel %vm256_vm9, %v1156_v50, %v1157_v29  ;;  %v1260_v57 = vpop.permute.xlu1 %1259 }
  0xac   :  { %v1044_v15 = vsel %vm130_vm7, %v2963_v16, %v1039_v42  ;;  %1884 = vmatprep.mubr.msk.f32.mxu0 %vm1046_vm15, %v1158_v5  ;;  %v1264_v16 = vsel %vm130_vm7, %v2994_v63, %v1256_v55  ;;  %v1266_v2 = vsel %vm130_vm7, %v2982_v10, %v1260_v57 }
  0xad   :  { %1875 = vmatprep.mubr.msk.f32.mxu1 %vm1046_vm15, %v1044_v15  ;;  %v1270_v0 = vrot.slane %v1264_v16, 2  ;;  %v1273_v25 = vrot.slane %v1266_v2, 2 }
  0xae   :  { %1883 = vmatpush3.msra.mxu0 %v3098_v3 }
  0xaf   :  { %1885 = vmatmul.mubr.msk.f32.vlgmr.msra.gmra.mrb[8].mxu0 %vm1046_vm15, %v1160_v45  ;;  %v1041_v26 = vpop.permute.xlu0 %1040  ;;  %v1372_v43 = vpop.permute.xlu1 %1371  ;;  %1964 = vmatprep.subr.bf16.mxu0 %v3056_v61 }
  0xb0   :  { %v1045_v41 = vsel %vm130_vm7, %v2986_v12, %v1041_v26  ;;  %1966 = vmatpush3.bf16.msra.mxu0 %v3056_v61  ;;  %v1379_v63 = vsel %vm130_vm7, %v3003_v60, %v1372_v43 }
  0xb1   :  { %1876 = vmatmul.mubr.msk.f32.vlgmr.msra.gmra.mrb[6].mxu1 %vm1046_vm15, %v1045_v41  ;;  %1900 = vmatprep.subr.mxu0 %v3098_v3  ;;  %v1385_v18 = vrot.slane %v1379_v63, 3 }
  0xb2   :  { %1962 = vmatpush3.bf16.msra.mxu1 %v3056_v61 }
  0xb3   :  { %v1258_v20 = vpop.permute.xlu0 %1257  ;;  %v1484_v22 = vpop.permute.xlu1 %1483  ;;  %1891 = vmatprep.subr.mxu1 %v3098_v3 }
  0xb4   :  { %v1265_v12 = vsel %vm130_vm7, %v3007_v28, %v1258_v20  ;;  %1901 = vmatpush3.msra.mxu0 %v3098_v3  ;;  %v1492_v17 = vsel %vm130_vm7, %v3026_v7, %v1484_v22 }
  0xb5   :  { %v1271_v44 = vrot.slane %v1265_v12, 2  ;;  %1972 = vmatprep.subr.bf16.mxu0 %v3056_v61 }
  0xb6   :  { %1892 = vmatpush3.msra.mxu1 %v3098_v3 }
  0xb7   :  { %v1370_v10 = vpop.permute.xlu0 %1369  ;;  %v1272_v36 = vsel %vm387_vm10, %v1270_v0, %v1271_v44  ;;  %v1274_v9 = vsel %vm387_vm10, %v1271_v44, %v1273_v25  ;;  %1968 = vmatprep.subr.bf16.mxu1 %v3056_v61  ;;  %v1488_v13 = vpop.permute.xlu1 %1487 }
  0xb8   :  { %v1378_v28 = vsel %vm130_vm7, %v3016_v34, %v1370_v10  ;;  %1893 = vmatprep.mubr.msk.f32.mxu1 %vm1046_vm15, %v1272_v36  ;;  %v1494_v8 = vsel %vm130_vm7, %v3030_v40, %v1488_v13 }
  0xb9   :  { %v1384_v56 = vrot.slane %v1378_v28, 3  ;;  %1894 = vmatmul.mubr.msk.f32.vlgmr.msra.gmra.mrb[8].mxu1 %vm1046_vm15, %v1274_v9  ;;  %v1501_v47 = vrot.slane %v1494_v8, 4  ;;  %v1761_v8 = vld [vmem:[%s3204_s4] ss:$0 sm:$0xff]  ;;  %s1979_s4 = scalar_lea.vmem %s1724_s15, 256 }
  0xba   :  { %1970 = vmatpush3.bf16.msra.mxu1 %v3056_v61  ;;  %p1980_p0 = scmp.ne.s32.totalorder %s1724_s15, %s1979_s4  ;;  %p1985_p2 = scmp.lt.s32.totalorder %s1979_s4, %s1979_s4 }
  0xbb   :  { %v1374_v60 = vpop.permute.xlu0 %1373  ;;  %v1386_v54 = vsel %vm518_vm11, %v1384_v56, %v1385_v18  ;;  %1909 = vmatprep.subr.mxu1 %v3098_v3  ;;  %v1600_v49 = vpop.permute.xlu1 %1599 }
  0xbc   :  { %v1380_v14 = vsel %vm130_vm7, %v3034_v11, %v1374_v60  ;;  %1902 = vmatprep.mubr.msk.f32.mxu0 %vm1046_vm15, %v1386_v54  ;;  %v1498_v11 = vrot.slane %v1492_v17, 4  ;;  %v1607_v7 = vsel %vm130_vm7, %v3049_v38, %v1600_v49  ;;  %p1986_p3 = por %p1985_p2, %p1984_p1 }
  0xbd   :  { %v1387_v34 = vrot.slane %v1380_v14, 3  ;;  %v1613_v33 = vrot.slane %v1607_v7, 5 }
  0xbe   :  { %1910 = vmatpush3.msra.mxu1 %v3098_v3  ;;  %p1987_p4 = pnand %p1986_p3, %p1980_p0 }
  0xbf   :  { %v1486_v24 = vpop.permute.xlu0 %1485  ;;  %v1388_v32 = vsel %vm518_vm11, %v1385_v18, %v1387_v34 }
  0xc0   :  { %v1493_v58 = vsel %vm130_vm7, %v3053_v39, %v1486_v24  ;;  %1903 = vmatmul.mubr.msk.f32.vlgmr.msra.gmra.mrb[10].mxu0 %vm1046_vm15, %v1388_v32 }
  0xc1   :  { %v1499_v35 = vrot.slane %v1493_v58, 4  ;;  %1974 = vmatpush3.bf16.msra.mxu0 %v3056_v61 }
  0xc2   :  { %1918 = vmatprep.subr.mxu0 %v3098_v3 }
  0xc3   :  { %v1598_v40 = vpop.permute.xlu0 %1597  ;;  %v1500_v59 = vsel %vm649_vm12, %v1498_v11, %v1499_v35  ;;  %v1502_v37 = vsel %vm649_vm12, %v1499_v35, %v1501_v47  ;;  %v1748_v35 = vld [vmem:[%s3202_s2] ss:$0 sm:$0xff] }
  0xc4   :  { %v1606_v39 = vsel %vm130_vm7, %v3066_v31, %v1598_v40  ;;  %1911 = vmatprep.mubr.msk.f32.mxu1 %vm1046_vm15, %v1500_v59 }
  0xc5   :  { %v1612_v48 = vrot.slane %v1606_v39, 5  ;;  %1912 = vmatmul.mubr.msk.f32.vlgmr.msra.gmra.mrb[10].mxu1 %vm1046_vm15, %v1502_v37  ;;  %1919 = vmatpush3.msra.mxu0 %v3098_v3 }
  0xc7   :  { %v1602_v61 = vpop.permute.xlu0 %1601  ;;  %v1614_v38 = vsel %vm780_vm13, %v1612_v48, %v1613_v33 }
  0xc8   :  { %v1608_v6 = vsel %vm130_vm7, %v3082_v1, %v1602_v61  ;;  %1920 = vmatprep.mubr.msk.f32.mxu0 %vm1046_vm15, %v1614_v38 }
  0xc9   :  { %v1615_v46 = vrot.slane %v1608_v6, 5 }
  0xcb   :  { %v1616_v51 = vsel %vm780_vm13, %v1613_v33, %v1615_v46 }
  0xcc   :  { %1921 = vmatmul.mubr.msk.f32.vlgmr.msra.gmra.mrb[12].mxu0 %vm1046_vm15, %v1616_v51 }
 0x15c   :  { %v1826_v31 = vpop.f32.mrb[0].mxu0  ;;  %v1833_v53 = vpop.f32.mrb[0].mxu1 }
 0x15d   :  { %v342_v19 = vmax.f32 %v1826_v31, %v1833_v53  ;;  %v203_v27 = vpop.f32.mrb[1].mxu0  ;;  %v332_v29 = vpop.f32.mrb[1].mxu1 }
 0x15e   :  { %v341_v23 = vmax.f32 %v203_v27, %v332_v29 }
 0x164   :  { %v1840_v30 = vpop.f32.mrb[2].mxu0 }
 0x165   :  { %v473_v3 = vmax.f32 %v342_v19, %v1840_v30  ;;  %v463_v62 = vpop.f32.mrb[3].mxu0 }
 0x166   :  { %v472_v4 = vmax.f32 %v341_v23, %v463_v62 }
 0x16b   :  { %v1847_v52 = vpop.f32.mrb[2].mxu1 }
 0x16c   :  { %v604_v55 = vmax.f32 %v473_v3, %v1847_v52  ;;  %v594_v1 = vpop.f32.mrb[3].mxu1 }
 0x16d   :  { %v603_v45 = vmax.f32 %v472_v4, %v594_v1 }
 0x170   :  { %v1854_v21 = vpop.f32.mrb[4].mxu0 }
 0x171   :  { %v735_v50 = vmax.f32 %v604_v55, %v1854_v21  ;;  %v725_v42 = vpop.f32.mrb[5].mxu0 }
 0x172   :  { %v734_v5 = vmax.f32 %v603_v45, %v725_v42 }
 0x177   :  { %v1861_v57 = vpop.f32.mrb[4].mxu1 }
 0x178   :  { %v866_v15 = vmax.f32 %v735_v50, %v1861_v57  ;;  %v856_v26 = vpop.f32.mrb[5].mxu1 }
 0x179   :  { %v865_v43 = vmax.f32 %v734_v5, %v856_v26 }
 0x17c   :  { %v1868_v41 = vpop.f32.mrb[6].mxu0 }
 0x17d   :  { %v997_v16 = vmax.f32 %v866_v15, %v1868_v41  ;;  %v987_v2 = vpop.f32.mrb[7].mxu0 }
 0x17e   :  { %v996_v20 = vmax.f32 %v865_v43, %v987_v2 }
 0x17f   :  { %v1005_v7 = vadd.f32 %v1748_v35, %v997_v16 }
 0x180   :  { %v1004_v40 = vadd.f32 %v1748_v35, %v996_v20 }
 0x182   :  { %v1886_v22 = vpop.f32.mrb[8].mxu0 }
 0x183   :  { %v1231_v12 = vpop.f32.mrb[9].mxu0 }
 0x184   :  { %v1877_v0 = vpop.f32.mrb[6].mxu1 }
 0x185   :  { %v1241_v25 = vmax.f32 %v1877_v0, %v1886_v22  ;;  %v1119_v44 = vpop.f32.mrb[7].mxu1 }
 0x186   :  { %v1240_v63 = vmax.f32 %v1119_v44, %v1231_v12 }
 0x18c   :  { %v1895_v10 = vpop.f32.mrb[8].mxu1 }
 0x18d   :  { %v1355_v36 = vmax.f32 %v1241_v25, %v1895_v10  ;;  %v1345_v9 = vpop.f32.mrb[9].mxu1 }
 0x18e   :  { %v1354_v28 = vmax.f32 %v1240_v63, %v1345_v9 }
 0x193   :  { %v1904_v18 = vpop.f32.mrb[10].mxu0 }
 0x194   :  { %v1469_v56 = vmax.f32 %v1355_v36, %v1904_v18  ;;  %v1459_v13 = vpop.f32.mrb[11].mxu0 }
 0x195   :  { %v1468_v60 = vmax.f32 %v1354_v28, %v1459_v13 }
 0x198   :  { %v1913_v54 = vpop.f32.mrb[10].mxu1 }
 0x199   :  { %v1583_v14 = vmax.f32 %v1469_v56, %v1913_v54  ;;  %v1573_v34 = vpop.f32.mrb[11].mxu1 }
 0x19a   :  { %v1582_v17 = vmax.f32 %v1468_v60, %v1573_v34 }
 0x19f   :  { %v1922_v49 = vpop.f32.mrb[12].mxu0 }
 0x1a0   :  { %v1697_v24 = vmax.f32 %v1583_v14, %v1922_v49  ;;  %v1687_v32 = vpop.f32.mrb[13].mxu0 }
 0x1a1   :  { %v1696_v58 = vmax.f32 %v1582_v17, %v1687_v32 }
 0x1a2   :  { %v1705_v11 = vadd.f32 %v1761_v8, %v1697_v24 }
 0x1a3   :  { %v1704_v47 = vadd.f32 %v1761_v8, %v1696_v58 }
 0x1a4   :  { %1710 = vrot.lane.b32.xlu0 %v1705_v11, %s2003_s9 }
 0x1a5   :  { %1708 = vrot.lane.b32.xlu1 %v1704_v47, %s2003_s9 }
 0x216   :  { %v1711_v59 = vpop.permute.xlu0 %1710 }
 0x217   :  { %v1715_v37 = vsel %vm127_vm8, %v1005_v7, %v1711_v59  ;;  %v1709_v39 = vpop.permute.xlu1 %1708 }
 0x218   :  { %1717 = vst.msk [vmem:[#allocation2 + $0x8] sm:$0xff] %vm130_vm7, %v1715_v37  ;;  %v1714_v33 = vsel %vm127_vm8, %v1004_v40, %v1709_v39 }
 0x219   :  { %1716 = vst.msk [vmem:[#allocation2] sm:$0xff] %vm130_vm7, %v1714_v33 }
 0x21a   :  { %1990 = shalt.err (!%p1987_p4)
}
 0x21b   :  { %s1991_s17 = scalar_lea.hbm %s3205_s5, 256 }
 0x21c   :  { %p1992_p5 = scmp.ne.s32.totalorder %s3205_s5, %s1991_s17  ;;  %p1995_p6 = scmp.lt.u32.totalorder %s1991_s17, %s3205_s5 }
 0x21e   :  { %p1997_p7 = pnand %p1995_p6, %p1992_p5 }
 0x220   :  { %2000 = shalt.err (!%p1997_p7)
}
 0x221   :  { %s2006_s22 = smov 128  }
 0x222   :  { %1729 = dma.vmem_to_hbm [thread:$0]  %s1724_s15, 256, %s3205_s5, [#allocation3], %s2006_s22, %s2006_s22, %s2003_s9  }
 0x223   :  { %2001 = dma.done.wait [#allocation3], 256  }
 0x224   :  { %2002 = vsyncadd [#allocation3], 4294967040 }
 0x225   :  { %1733 = vsyncpa [#allocation3], 1 }

</bundles_post_ra>
